<compile_context>
chip_gen: v6e
topology: v6e:2x2x1
jax: 0.10.0
libtpu: 0.0.40
codegen_flags: <defaults>
</compile_context>

<pallas_src>
import numpy as np
import jax
import jax.numpy as jnp
from jax.experimental import pallas as pl
from jax.experimental.pallas import tpu as pltpu

PREC = jax.lax.Precision.HIGHEST


# ----------------------------------------------------------------------------
# helpers
# ----------------------------------------------------------------------------

def _gelu(x):
    c = 0.7978845608028654  # sqrt(2/pi)
    return 0.5 * x * (1.0 + jnp.tanh(c * (x + 0.044715 * x * x * x)))


def _cparams(*sem):
    return pltpu.CompilerParams(dimension_semantics=tuple(sem),
                                vmem_limit_bytes=48 * 1024 * 1024)


def _pick_token_tile(n, target=512):
    # largest multiple-of-8 divisor of n that is <= target (full n if n is small)
    if n <= target:
        return n
    for t in range(target, 7, -1):
        if n % t == 0 and t % 8 == 0:
            return t
    return n


def _pick_row_tile(h, target=64):
    if h <= target:
        return h
    for t in range(target, 0, -1):
        if h % t == 0:
            return t
    return h


# ----------------------------------------------------------------------------
# 1) fused QKV projection + per-head gram / norm statistics + softmax(A)
#    outputs: v_inp (B,N,D)  and  A (B,heads,dh,dh)   (q,k never hit HBM)
# ----------------------------------------------------------------------------

def qkv_gram(x_tok, wq, wk, wv, rescale_b, heads, use_pallas=True):
    B, N, C = x_tok.shape
    D = wq.shape[1]
    dh = D // heads

    if not use_pallas:
        q = jnp.einsum('bnc,cd->bnd', x_tok, wq, precision=PREC)
        k = jnp.einsum('bnc,cd->bnd', x_tok, wk, precision=PREC)
        v = jnp.einsum('bnc,cd->bnd', x_tok, wv, precision=PREC)
        qh = q.reshape(B, N, heads, dh)
        kh = k.reshape(B, N, heads, dh)
        g = jnp.einsum('bnhi,bnhj->bhij', kh, qh, precision=PREC)
        inv_q = jax.lax.rsqrt(jnp.maximum(jnp.sum(qh * qh, axis=1), 1e-24))  # (B,heads,dh)
        inv_k = jax.lax.rsqrt(jnp.maximum(jnp.sum(kh * kh, axis=1), 1e-24))
        s = g * inv_k[:, :, :, None] * inv_q[:, :, None, :]
        s = s * rescale_b.reshape(1, heads, 1, dh)
        a = jax.nn.softmax(s, axis=-1)
        return v, a

    TM = _pick_token_tile(N)
    nM = N // TM

    def kern(x_ref, wq_ref, wk_ref, wv_ref, rs_ref, v_ref, a_ref,
             g_acc, q2_acc, k2_acc):
        mi = pl.program_id(1)

        @pl.when(mi == 0)
        def _():
            g_acc[...] = jnp.zeros_like(g_acc)
            q2_acc[...] = jnp.zeros_like(q2_acc)
            k2_acc[...] = jnp.zeros_like(k2_acc)

        x = x_ref[0]                                                        # (TM, C)
        q = jnp.dot(x, wq_ref[...], preferred_element_type=jnp.float32)     # (TM, D)
        k = jnp.dot(x, wk_ref[...], preferred_element_type=jnp.float32)
        v = jnp.dot(x, wv_ref[...], preferred_element_type=jnp.float32)
        v_ref[...] = v[None]

        q2_acc[...] += jnp.sum(q * q, axis=0, keepdims=True)                # (1, D)
        k2_acc[...] += jnp.sum(k * k, axis=0, keepdims=True)
        for h in range(heads):
            sl = slice(h * dh, (h + 1) * dh)
            g_acc[h] += jnp.dot(k[:, sl].T, q[:, sl],
                                preferred_element_type=jnp.float32)          # K_h^T Q_h

        @pl.when(mi == nM - 1)
        def _():
            inv_q = jax.lax.rsqrt(jnp.maximum(q2_acc[...], 1e-24))          # (1, D)
            inv_k = jax.lax.rsqrt(jnp.maximum(k2_acc[...], 1e-24))
            inv_q = inv_q * rs_ref[...]                                     # fold per-head rescale
            for h in range(heads):
                sl = slice(h * dh, (h + 1) * dh)
                ik_col = jnp.transpose(jnp.broadcast_to(inv_k[:, sl], (dh, dh)))
                s = g_acc[h] * ik_col * inv_q[:, sl]
                m = jnp.max(s, axis=-1, keepdims=True)
                e = jnp.exp(s - m)
                a_ref[0, h] = e / jnp.sum(e, axis=-1, keepdims=True)

    return pl.pallas_call(
        kern,
        out_shape=(jax.ShapeDtypeStruct((B, N, D), jnp.float32),
                   jax.ShapeDtypeStruct((B, heads, dh, dh), jnp.float32)),
        grid=(B, nM),
        in_specs=[pl.BlockSpec((1, TM, C), lambda b, m: (b, m, 0)),
                  pl.BlockSpec((C, D), lambda b, m: (0, 0)),
                  pl.BlockSpec((C, D), lambda b, m: (0, 0)),
                  pl.BlockSpec((C, D), lambda b, m: (0, 0)),
                  pl.BlockSpec((1, D), lambda b, m: (0, 0))],
        out_specs=(pl.BlockSpec((1, TM, D), lambda b, m: (b, m, 0)),
                   pl.BlockSpec((1, heads, dh, dh), lambda b, m: (b, 0, 0, 0))),
        scratch_shapes=[pltpu.VMEM((heads, dh, dh), jnp.float32),
                        pltpu.VMEM((1, D), jnp.float32),
                        pltpu.VMEM((1, D), jnp.float32)],
        compiler_params=_cparams("parallel", "arbitrary"),
    )(x_tok, wq, wk, wv, rescale_b)


# ----------------------------------------------------------------------------
# 2) depthwise 3x3 conv (bias-free), H-tiled with manual halo DMA, optional fused GELU
# ----------------------------------------------------------------------------

def dwconv3(x, w9, gelu_out, use_pallas=True):
    # x: (B, H, W, C); w9: (9, C)
    B, H, W, C = x.shape
    xp = jnp.pad(x, ((0, 0), (1, 1), (1, 1), (0, 0)))

    if not use_pallas:
        acc = jnp.zeros((B, H, W, C), jnp.float32)
        for i in range(3):
            for j in range(3):
                acc = acc + xp[:, i:i + H, j:j + W, :] * w9[i * 3 + j][None, None, None, :]
        return _gelu(acc) if gelu_out else acc

    TH = _pick_row_tile(H)
    nH = H // TH

    def kern(xp_hbm, w_ref, o_ref, xbuf, sem):
        n = pl.program_id(0)
        ih = pl.program_id(1)
        cp = pltpu.make_async_copy(xp_hbm.at[n, pl.ds(ih * TH, TH + 2)], xbuf, sem)
        cp.start()
        cp.wait()
        x_t = xbuf[...]                                   # (TH+2, W+2, C)
        w = w_ref[...]
        acc = jnp.zeros((TH, W, C), jnp.float32)
        for i in range(3):
            for j in range(3):
                acc = acc + x_t[i:i + TH, j:j + W, :] * w[i * 3 + j][None, None, :]
        if gelu_out:
            acc = _gelu(acc)
        o_ref[...] = acc[None]

    return pl.pallas_call(
        kern,
        out_shape=jax.ShapeDtypeStruct((B, H, W, C), jnp.float32),
        grid=(B, nH),
        in_specs=[pl.BlockSpec(memory_space=pl.ANY),
                  pl.BlockSpec((9, C), lambda n, i: (0, 0))],
        out_specs=pl.BlockSpec((1, TH, W, C), lambda n, i: (n, i, 0, 0)),
        scratch_shapes=[pltpu.VMEM((TH + 2, W + 2, C), jnp.float32),
                        pltpu.SemaphoreType.DMA(())],
        compiler_params=_cparams("parallel", "parallel"),
    )(xp, w9)


# ----------------------------------------------------------------------------
# 3) attention epilogue: (V*illu)_h @ A_h^T -> proj (+bias) + pos_emb + residual
# ----------------------------------------------------------------------------

def attn_out(v_inp, illu_tok, a, w_proj, b_proj, pos_tok, x_tok, heads, use_pallas=True):
    B, N, D = v_inp.shape
    C = w_proj.shape[1]
    dh = D // heads

    if not use_pallas:
        vs = (v_inp * illu_tok).reshape(B, N, heads, dh)
        t = jnp.einsum('bnhj,bhij->bnhi', vs, a, precision=PREC).reshape(B, N, D)
        out_c = jnp.einsum('bnd,dc->bnc', t, w_proj, precision=PREC) + b_proj[None]
        return out_c + pos_tok + x_tok

    TM = _pick_token_tile(N)
    nM = N // TM

    def kern(v_ref, il_ref, a_ref, wp_ref, bp_ref, pos_ref, x_ref, o_ref):
        vs = v_ref[0] * il_ref[0]                                            # (TM, D)
        acc = bp_ref[...] + pos_ref[0] + x_ref[0]                            # (TM, C)
        for h in range(heads):
            sl = slice(h * dh, (h + 1) * dh)
            t_h = jnp.dot(vs[:, sl], a_ref[0, h].T,
                          preferred_element_type=jnp.float32)                # (TM, dh)
            acc = acc + jnp.dot(t_h, wp_ref[sl, :],
                                preferred_element_type=jnp.float32)
        o_ref[...] = acc[None]

    return pl.pallas_call(
        kern,
        out_shape=jax.ShapeDtypeStruct((B, N, C), jnp.float32),
        grid=(B, nM),
        in_specs=[pl.BlockSpec((1, TM, D), lambda b, m: (b, m, 0)),
                  pl.BlockSpec((1, TM, C), lambda b, m: (b, m, 0)),
                  pl.BlockSpec((1, heads, dh, dh), lambda b, m: (b, 0, 0, 0)),
                  pl.BlockSpec((D, C), lambda b, m: (0, 0)),
                  pl.BlockSpec((1, C), lambda b, m: (0, 0)),
                  pl.BlockSpec((1, TM, C), lambda b, m: (b, m, 0)),
                  pl.BlockSpec((1, TM, C), lambda b, m: (b, m, 0))],
        out_specs=pl.BlockSpec((1, TM, C), lambda b, m: (b, m, 0)),
        compiler_params=_cparams("parallel", "parallel"),
    )(v_inp, illu_tok, a, w_proj, b_proj, pos_tok, x_tok)


# ----------------------------------------------------------------------------
# 4) PreNorm + FFN up-projection (LayerNorm + 1x1 conv + GELU fused)
# ----------------------------------------------------------------------------

def ffn_up(x_tok, ln_g, ln_b, w1, use_pallas=True):
    B, N, C = x_tok.shape
    Hd = w1.shape[1]

    if not use_pallas:
        mu = jnp.mean(x_tok, axis=-1, keepdims=True)
        xc = x_tok - mu
        var = jnp.mean(xc * xc, axis=-1, keepdims=True)
        xn = xc * jax.lax.rsqrt(var + 1e-5) * ln_g[None] + ln_b[None]
        return _gelu(jnp.einsum('bnc,ch->bnh', xn, w1, precision=PREC))

    TM = _pick_token_tile(N)
    nM = N // TM

    def kern(x_ref, g_ref, b_ref, w_ref, o_ref):
        x = x_ref[0]                                                         # (TM, C)
        mu = jnp.mean(x, axis=-1, keepdims=True)
        xc = x - mu
        var = jnp.mean(xc * xc, axis=-1, keepdims=True)
        xn = xc * jax.lax.rsqrt(var + 1e-5) * g_ref[...] + b_ref[...]
        hid = jnp.dot(xn, w_ref[...], preferred_element_type=jnp.float32)
        o_ref[...] = _gelu(hid)[None]

    return pl.pallas_call(
        kern,
        out_shape=jax.ShapeDtypeStruct((B, N, Hd), jnp.float32),
        grid=(B, nM),
        in_specs=[pl.BlockSpec((1, TM, C), lambda b, m: (b, m, 0)),
                  pl.BlockSpec((1, C), lambda b, m: (0, 0)),
                  pl.BlockSpec((1, C), lambda b, m: (0, 0)),
                  pl.BlockSpec((C, Hd), lambda b, m: (0, 0))],
        out_specs=pl.BlockSpec((1, TM, Hd), lambda b, m: (b, m, 0)),
        compiler_params=_cparams("parallel", "parallel"),
    )(x_tok, ln_g, ln_b, w1)


# ----------------------------------------------------------------------------
# 5) FFN down-projection + residual
# ----------------------------------------------------------------------------

def ffn_down(h_tok, w2, res_tok, use_pallas=True):
    B, N, Hd = h_tok.shape
    C = w2.shape[1]

    if not use_pallas:
        return jnp.einsum('bnh,hc->bnc', h_tok, w2, precision=PREC) + res_tok

    TM = _pick_token_tile(N)
    nM = N // TM

    def kern(h_ref, w_ref, r_ref, o_ref):
        o = jnp.dot(h_ref[0], w_ref[...], preferred_element_type=jnp.float32)
        o_ref[...] = (o + r_ref[0])[None]

    return pl.pallas_call(
        kern,
        out_shape=jax.ShapeDtypeStruct((B, N, C), jnp.float32),
        grid=(B, nM),
        in_specs=[pl.BlockSpec((1, TM, Hd), lambda b, m: (b, m, 0)),
                  pl.BlockSpec((Hd, C), lambda b, m: (0, 0)),
                  pl.BlockSpec((1, TM, C), lambda b, m: (b, m, 0))],
        out_specs=pl.BlockSpec((1, TM, C), lambda b, m: (b, m, 0)),
        compiler_params=_cparams("parallel", "parallel"),
    )(h_tok, w2, res_tok)


# ----------------------------------------------------------------------------
# IGAB forward
# ----------------------------------------------------------------------------

def igab_forward(x_nchw, illu_nchw, params, heads, use_pallas=True):
    B, C, H, W = x_nchw.shape
    N = H * W
    x_tok = jnp.transpose(x_nchw, (0, 2, 3, 1)).reshape(B, N, C)
    illu_tok = jnp.transpose(illu_nchw, (0, 2, 3, 1)).reshape(B, N, C)

    for blk in params["blocks"]:
        # ---- IG_MSA + residual ----
        v_inp, a = qkv_gram(x_tok, blk["wq"], blk["wk"], blk["wv"],
                            blk["rescale_b"], heads, use_pallas)
        p = dwconv3(v_inp.reshape(B, H, W, C), blk["pos_w1"],
                    gelu_out=True, use_pallas=use_pallas)
        pos = dwconv3(p, blk["pos_w2"], gelu_out=False, use_pallas=use_pallas)
        x_tok = attn_out(v_inp, illu_tok, a, blk["proj_w"], blk["proj_b"],
                         pos.reshape(B, N, C), x_tok, heads, use_pallas)
        # ---- PreNorm(FeedForward) + residual ----
        hid = ffn_up(x_tok, blk["ln_g"], blk["ln_b"], blk["ffn_w1"], use_pallas)
        Hd = hid.shape[-1]
        hid = dwconv3(hid.reshape(B, H, W, Hd), blk["ffn_dw"],
                      gelu_out=True, use_pallas=use_pallas)
        x_tok = ffn_down(hid.reshape(B, N, Hd), blk["ffn_w2"], x_tok, use_pallas)

    out = x_tok.reshape(B, H, W, C)
    return jnp.transpose(out, (0, 3, 1, 2))


def make_params(dim, dim_head, heads, num_blocks, seed=0):
    assert dim == dim_head * heads, "IGAB requires dim == heads * dim_head"
    D = dim_head * heads
    Hd = dim * 4
    key = jax.random.PRNGKey(seed)
    blocks = []
    for _ in range(num_blocks):
        key, *ks = jax.random.split(key, 14)
        rescale = 1.0 + 0.1 * jax.random.normal(ks[3], (heads,), jnp.float32)
        blocks.append({
            "wq": 0.1 * jax.random.normal(ks[0], (dim, D), jnp.float32),
            "wk": 0.1 * jax.random.normal(ks[1], (dim, D), jnp.float32),
            "wv": 0.1 * jax.random.normal(ks[2], (dim, D), jnp.float32),
            "rescale_b": jnp.repeat(rescale[:, None], dim_head, axis=1).reshape(1, D),
            "proj_w": 0.1 * jax.random.normal(ks[4], (D, dim), jnp.float32),
            "proj_b": 0.01 * jax.random.normal(ks[5], (1, dim), jnp.float32),
            "pos_w1": 0.1 * jax.random.normal(ks[6], (9, dim), jnp.float32),
            "pos_w2": 0.1 * jax.random.normal(ks[7], (9, dim), jnp.float32),
            "ln_g": 1.0 + 0.1 * jax.random.normal(ks[8], (1, dim), jnp.float32),
            "ln_b": 0.01 * jax.random.normal(ks[9], (1, dim), jnp.float32),
            "ffn_w1": 0.1 * jax.random.normal(ks[10], (dim, Hd), jnp.float32),
            "ffn_dw": 0.1 * jax.random.normal(ks[11], (9, Hd), jnp.float32),
            "ffn_w2": 0.1 * jax.random.normal(ks[12], (Hd, dim), jnp.float32),
        })
    return {"blocks": blocks}


if __name__ == "__main__":
    B, H, W = 2, 16, 16
    DIM, HEADS, DIM_HEAD = 64, 2, 32   # IGAB usage requires dim == heads * dim_head
    NUM_BLOCKS = 2

    k1, k2 = jax.random.split(jax.random.PRNGKey(0))
    x_nchw = jax.random.normal(k1, (B, DIM, H, W), jnp.float32)      # PyTorch layout
    illu_nchw = jax.random.normal(k2, (B, DIM, H, W), jnp.float32)

    params = make_params(DIM, DIM_HEAD, HEADS, NUM_BLOCKS, seed=0)

    out = igab_forward(x_nchw, illu_nchw, params, HEADS, use_pallas=True)
    out = jax.block_until_ready(out)

    # Reference check: identical math in plain JAX/XLA
    ref = igab_forward(x_nchw, illu_nchw, params, HEADS, use_pallas=False)
    ref = jax.block_until_ready(ref)

    assert out.shape == (B, DIM, H, W)
    max_diff = float(np.max(np.abs(np.asarray(out) - np.asarray(ref))))
    assert np.allclose(np.asarray(out), np.asarray(ref), rtol=2e-2, atol=2e-2), max_diff

    print("KERNEL_OK")
</pallas_src>

<mosaic_0001>
module attributes {stable_mosaic.version = 11 : i64} {
  func.func @kern(%arg0: i32, %arg1: i32, %arg2: memref<1x256x64xf32, #tpu.memory_space<vmem>>, %arg3: memref<64x64xf32, #tpu.memory_space<vmem>>, %arg4: memref<64x64xf32, #tpu.memory_space<vmem>>, %arg5: memref<64x64xf32, #tpu.memory_space<vmem>>, %arg6: memref<1x64xf32, #tpu.memory_space<vmem>>, %arg7: memref<1x256x64xf32, #tpu.memory_space<vmem>>, %arg8: memref<1x2x32x32xf32, #tpu.memory_space<vmem>>, %arg9: memref<2x32x32xf32, #tpu.memory_space<vmem>>, %arg10: memref<1x64xf32, #tpu.memory_space<vmem>>, %arg11: memref<1x64xf32, #tpu.memory_space<vmem>>) attributes {dimension_semantics = [#tpu.dimension_semantics<parallel>, #tpu.dimension_semantics<arbitrary>], iteration_bounds = array<i64: 2, 1>, scalar_prefetch = 0 : i64, scratch_operands = 3 : i64, tpu.core_type = #tpu.core_type<tc>, window_params = [{transform_indices = @transform_0, window_bounds = array<i64: 1, 256, 64>}, {pipeline_mode = #tpu.pipeline_mode<synchronous>, transform_indices = @transform_1, window_bounds = array<i64: 64, 64>}, {pipeline_mode = #tpu.pipeline_mode<synchronous>, transform_indices = @transform_2, window_bounds = array<i64: 64, 64>}, {pipeline_mode = #tpu.pipeline_mode<synchronous>, transform_indices = @transform_3, window_bounds = array<i64: 64, 64>}, {pipeline_mode = #tpu.pipeline_mode<synchronous>, transform_indices = @transform_4, window_bounds = array<i64: 1, 64>}, {transform_indices = @transform_5, window_bounds = array<i64: 1, 256, 64>}, {transform_indices = @transform_6, window_bounds = array<i64: 1, 2, 32, 32>}]} {
    %c0_i32 = arith.constant 0 : i32
    %0 = arith.cmpi eq, %arg1, %c0_i32 : i32
    %1 = arith.extui %0 : i1 to i32
    %c0_i32_0 = arith.constant 0 : i32
    %2 = arith.cmpi ne, %1, %c0_i32_0 : i32
    scf.if %2 {
      %cst_39 = arith.constant 0.000000e+00 : f32
      %48 = vector.broadcast %cst_39 : f32 to vector<2x32x32xf32>
      %c0_40 = arith.constant 0 : index
      %c0_41 = arith.constant 0 : index
      %c0_42 = arith.constant 0 : index
      %49 = vector.load %arg9[%c0_40, %c0_41, %c0_42] : memref<2x32x32xf32, #tpu.memory_space<vmem>>, vector<2x32x32xf32>
      tpu.vector_store %arg9[%c0_40, %c0_41, %c0_42], %48 {strides = array<i32>} : memref<2x32x32xf32, #tpu.memory_space<vmem>>, vector<2x32x32xf32>,
      %cst_43 = arith.constant 0.000000e+00 : f32
      %50 = vector.broadcast %cst_43 : f32 to vector<1x64xf32>
      %c0_44 = arith.constant 0 : index
      %c0_45 = arith.constant 0 : index
      %51 = vector.load %arg10[%c0_44, %c0_45] : memref<1x64xf32, #tpu.memory_space<vmem>>, vector<1x64xf32>
      tpu.vector_store %arg10[%c0_44, %c0_45], %50 {strides = array<i32>} : memref<1x64xf32, #tpu.memory_space<vmem>>, vector<1x64xf32>,
      %cst_46 = arith.constant 0.000000e+00 : f32
      %52 = vector.broadcast %cst_46 : f32 to vector<1x64xf32>
      %c0_47 = arith.constant 0 : index
      %c0_48 = arith.constant 0 : index
      %53 = vector.load %arg11[%c0_47, %c0_48] : memref<1x64xf32, #tpu.memory_space<vmem>>, vector<1x64xf32>
      tpu.vector_store %arg11[%c0_47, %c0_48], %52 {strides = array<i32>} : memref<1x64xf32, #tpu.memory_space<vmem>>, vector<1x64xf32>,
    } else {
    }
    %c0 = arith.constant 0 : index
    %c0_1 = arith.constant 0 : index
    %c0_2 = arith.constant 0 : index
    %3 = vector.load %arg2[%c0, %c0_1, %c0_2] : memref<1x256x64xf32, #tpu.memory_space<vmem>>, vector<1x256x64xf32>
    %4 = vector.shape_cast %3 : vector<1x256x64xf32> to vector<256x64xf32>
    %c0_3 = arith.constant 0 : index
    %c0_4 = arith.constant 0 : index
    %5 = vector.load %arg3[%c0_3, %c0_4] : memref<64x64xf32, #tpu.memory_space<vmem>>, vector<64x64xf32>
    %cst = arith.constant dense<0.000000e+00> : vector<256x64xf32>
    %6 = tpu.matmul %4, %5, %cst {dimension_numbers = #tpu.dot_dimension_numbers<[1], [0], [0], [1], [0, 0, 1, 1], [], []>} : vector<256x64xf32>, vector<64x64xf32>, vector<256x64xf32> -> vector<256x64xf32>
    %c0_5 = arith.constant 0 : index
    %c0_6 = arith.constant 0 : index
    %7 = vector.load %arg4[%c0_5, %c0_6] : memref<64x64xf32, #tpu.memory_space<vmem>>, vector<64x64xf32>
    %cst_7 = arith.constant dense<0.000000e+00> : vector<256x64xf32>
    %8 = tpu.matmul %4, %7, %cst_7 {dimension_numbers = #tpu.dot_dimension_numbers<[1], [0], [0], [1], [0, 0, 1, 1], [], []>} : vector<256x64xf32>, vector<64x64xf32>, vector<256x64xf32> -> vector<256x64xf32>
    %c0_8 = arith.constant 0 : index
    %c0_9 = arith.constant 0 : index
    %9 = vector.load %arg5[%c0_8, %c0_9] : memref<64x64xf32, #tpu.memory_space<vmem>>, vector<64x64xf32>
    %cst_10 = arith.constant dense<0.000000e+00> : vector<256x64xf32>
    %10 = tpu.matmul %4, %9, %cst_10 {dimension_numbers = #tpu.dot_dimension_numbers<[1], [0], [0], [1], [0, 0, 1, 1], [], []>} : vector<256x64xf32>, vector<64x64xf32>, vector<256x64xf32> -> vector<256x64xf32>
    %11 = vector.shape_cast %10 : vector<256x64xf32> to vector<1x256x64xf32>
    %c0_11 = arith.constant 0 : index
    %c0_12 = arith.constant 0 : index
    %c0_13 = arith.constant 0 : index
    %12 = vector.load %arg7[%c0_11, %c0_12, %c0_13] : memref<1x256x64xf32, #tpu.memory_space<vmem>>, vector<1x256x64xf32>
    tpu.vector_store %arg7[%c0_11, %c0_12, %c0_13], %11 {strides = array<i32>} : memref<1x256x64xf32, #tpu.memory_space<vmem>>, vector<1x256x64xf32>,
    %c0_14 = arith.constant 0 : index
    %c0_15 = arith.constant 0 : index
    %13 = vector.load %arg10[%c0_14, %c0_15] : memref<1x64xf32, #tpu.memory_space<vmem>>, vector<1x64xf32>
    %14 = arith.mulf %6, %6 : vector<256x64xf32>
    %cst_16 = arith.constant dense<0.000000e+00> : vector<64xf32>
    %15 = vector.multi_reduction <add>, %14, %cst_16 [0] : vector<256x64xf32> to vector<64xf32>
    %16 = vector.shape_cast %15 : vector<64xf32> to vector<1x64xf32>
    %17 = arith.addf %13, %16 : vector<1x64xf32>
    %c0_17 = arith.constant 0 : index
    %c0_18 = arith.constant 0 : index
    %18 = vector.load %arg10[%c0_17, %c0_18] : memref<1x64xf32, #tpu.memory_space<vmem>>, vector<1x64xf32>
    tpu.vector_store %arg10[%c0_17, %c0_18], %17 {strides = array<i32>} : memref<1x64xf32, #tpu.memory_space<vmem>>, vector<1x64xf32>,
    %c0_19 = arith.constant 0 : index
    %c0_20 = arith.constant 0 : index
    %19 = vector.load %arg11[%c0_19, %c0_20] : memref<1x64xf32, #tpu.memory_space<vmem>>, vector<1x64xf32>
    %20 = arith.mulf %8, %8 : vector<256x64xf32>
    %cst_21 = arith.constant dense<0.000000e+00> : vector<64xf32>
    %21 = vector.multi_reduction <add>, %20, %cst_21 [0] : vector<256x64xf32> to vector<64xf32>
    %22 = vector.shape_cast %21 : vector<64xf32> to vector<1x64xf32>
    %23 = arith.addf %19, %22 : vector<1x64xf32>
    %c0_22 = arith.constant 0 : index
    %c0_23 = arith.constant 0 : index
    %24 = vector.load %arg11[%c0_22, %c0_23] : memref<1x64xf32, #tpu.memory_space<vmem>>, vector<1x64xf32>
    tpu.vector_store %arg11[%c0_22, %c0_23], %23 {strides = array<i32>} : memref<1x64xf32, #tpu.memory_space<vmem>>, vector<1x64xf32>,
    %c0_24 = arith.constant 0 : index
    %c0_25 = arith.constant 0 : index
    %c0_26 = arith.constant 0 : index
    %25 = vector.load %arg9[%c0_24, %c0_25, %c0_26] : memref<2x32x32xf32, #tpu.memory_space<vmem>>, vector<1x32x32xf32>
    %26 = vector.shape_cast %25 : vector<1x32x32xf32> to vector<32x32xf32>
    %27 = vector.extract_strided_slice %8 {offsets = [0, 0], sizes = [256, 32], strides = [1, 1]} : vector<256x64xf32> to vector<256x32xf32>
    %28 = tpu.transpose %27, [1, 0] : vector<256x32xf32> -> vector<32x256xf32>
    %29 = vector.extract_strided_slice %6 {offsets = [0, 0], sizes = [256, 32], strides = [1, 1]} : vector<256x64xf32> to vector<256x32xf32>
    %cst_27 = arith.constant dense<0.000000e+00> : vector<32x32xf32>
    %30 = tpu.matmul %28, %29, %cst_27 {dimension_numbers = #tpu.dot_dimension_numbers<[1], [0], [0], [1], [0, 0, 1, 1], [], []>} : vector<32x256xf32>, vector<256x32xf32>, vector<32x32xf32> -> vector<32x32xf32>
    %31 = arith.addf %26, %30 : vector<32x32xf32>
    %c0_28 = arith.constant 0 : index
    %c0_29 = arith.constant 0 : index
    %c0_30 = arith.constant 0 : index
    %32 = vector.load %arg9[%c0_28, %c0_29, %c0_30] : memref<2x32x32xf32, #tpu.memory_space<vmem>>, vector<1x32x32xf32>
    %33 = vector.shape_cast %32 : vector<1x32x32xf32> to vector<32x32xf32>
    %34 = vector.shape_cast %31 : vector<32x32xf32> to vector<1x32x32xf32>
    tpu.vector_store %arg9[%c0_28, %c0_29, %c0_30], %34 {strides = array<i32>} : memref<2x32x32xf32, #tpu.memory_space<vmem>>, vector<1x32x32xf32>,
    %c1 = arith.constant 1 : index
    %c0_31 = arith.constant 0 : index
    %c0_32 = arith.constant 0 : index
    %35 = vector.load %arg9[%c1, %c0_31, %c0_32] : memref<2x32x32xf32, #tpu.memory_space<vmem>>, vector<1x32x32xf32>
    %36 = vector.shape_cast %35 : vector<1x32x32xf32> to vector<32x32xf32>
    %37 = vector.extract_strided_slice %8 {offsets = [0, 32], sizes = [256, 32], strides = [1, 1]} : vector<256x64xf32> to vector<256x32xf32>
    %38 = tpu.transpose %37, [1, 0] : vector<256x32xf32> -> vector<32x256xf32>
    %39 = vector.extract_strided_slice %6 {offsets = [0, 32], sizes = [256, 32], strides = [1, 1]} : vector<256x64xf32> to vector<256x32xf32>
    %cst_33 = arith.constant dense<0.000000e+00> : vector<32x32xf32>
    %40 = tpu.matmul %38, %39, %cst_33 {dimension_numbers = #tpu.dot_dimension_numbers<[1], [0], [0], [1], [0, 0, 1, 1], [], []>} : vector<32x256xf32>, vector<256x32xf32>, vector<32x32xf32> -> vector<32x32xf32>
    %41 = arith.addf %36, %40 : vector<32x32xf32>
    %c1_34 = arith.constant 1 : index
    %c0_35 = arith.constant 0 : index
    %c0_36 = arith.constant 0 : index
    %42 = vector.load %arg9[%c1_34, %c0_35, %c0_36] : memref<2x32x32xf32, #tpu.memory_space<vmem>>, vector<1x32x32xf32>
    %43 = vector.shape_cast %42 : vector<1x32x32xf32> to vector<32x32xf32>
    %44 = vector.shape_cast %41 : vector<32x32xf32> to vector<1x32x32xf32>
    tpu.vector_store %arg9[%c1_34, %c0_35, %c0_36], %44 {strides = array<i32>} : memref<2x32x32xf32, #tpu.memory_space<vmem>>, vector<1x32x32xf32>,
    %c0_i32_37 = arith.constant 0 : i32
    %45 = arith.cmpi eq, %arg1, %c0_i32_37 : i32
    %46 = arith.extui %45 : i1 to i32
    %c0_i32_38 = arith.constant 0 : i32
    %47 = arith.cmpi ne, %46, %c0_i32_38 : i32
    scf.if %47 {
      %c0_39 = arith.constant 0 : index
      %c0_40 = arith.constant 0 : index
      %48 = vector.load %arg10[%c0_39, %c0_40] : memref<1x64xf32, #tpu.memory_space<vmem>>, vector<1x64xf32>
      %cst_41 = arith.constant 1.000000e-24 : f32
      %49 = vector.broadcast %cst_41 : f32 to vector<1x64xf32>
      %50 = arith.maximumf %48, %49 : vector<1x64xf32>
      %51 = math.rsqrt %50 : vector<1x64xf32>
      %c0_42 = arith.constant 0 : index
      %c0_43 = arith.constant 0 : index
      %52 = vector.load %arg11[%c0_42, %c0_43] : memref<1x64xf32, #tpu.memory_space<vmem>>, vector<1x64xf32>
      %cst_44 = arith.constant 1.000000e-24 : f32
      %53 = vector.broadcast %cst_44 : f32 to vector<1x64xf32>
      %54 = arith.maximumf %52, %53 : vector<1x64xf32>
      %55 = math.rsqrt %54 : vector<1x64xf32>
      %c0_45 = arith.constant 0 : index
      %c0_46 = arith.constant 0 : index
      %56 = vector.load %arg6[%c0_45, %c0_46] : memref<1x64xf32, #tpu.memory_space<vmem>>, vector<1x64xf32>
      %57 = arith.mulf %51, %56 : vector<1x64xf32>
      %58 = vector.extract_strided_slice %55 {offsets = [0, 0], sizes = [1, 32], strides = [1, 1]} : vector<1x64xf32> to vector<1x32xf32>
      %59 = vector.shape_cast %58 : vector<1x32xf32> to vector<1x32xf32>
      %60 = vector.broadcast %59 : vector<1x32xf32> to vector<32x32xf32>
      %61 = tpu.transpose %60, [1, 0] : vector<32x32xf32> -> vector<32x32xf32>
      %c0_47 = arith.constant 0 : index
      %c0_48 = arith.constant 0 : index
      %c0_49 = arith.constant 0 : index
      %62 = vector.load %arg9[%c0_47, %c0_48, %c0_49] : memref<2x32x32xf32, #tpu.memory_space<vmem>>, vector<1x32x32xf32>
      %63 = vector.shape_cast %62 : vector<1x32x32xf32> to vector<32x32xf32>
      %64 = arith.mulf %63, %61 : vector<32x32xf32>
      %65 = vector.extract_strided_slice %57 {offsets = [0, 0], sizes = [1, 32], strides = [1, 1]} : vector<1x64xf32> to vector<1x32xf32>
      %66 = vector.broadcast %65 : vector<1x32xf32> to vector<32x32xf32>
      %67 = arith.mulf %64, %66 : vector<32x32xf32>
      %cst_50 = arith.constant dense<0xFF800000> : vector<32xf32>
      %68 = vector.multi_reduction <maximumf>, %67, %cst_50 [1] : vector<32x32xf32> to vector<32xf32>
      %69 = vector.shape_cast %68 : vector<32xf32> to vector<32x1xf32>
      %70 = vector.broadcast %69 : vector<32x1xf32> to vector<32x32xf32>
      %71 = arith.subf %67, %70 : vector<32x32xf32>
      %72 = math.exp %71 : vector<32x32xf32>
      %cst_51 = arith.constant dense<0.000000e+00> : vector<32xf32>
      %73 = vector.multi_reduction <add>, %72, %cst_51 [1] : vector<32x32xf32> to vector<32xf32>
      %74 = vector.shape_cast %73 : vector<32xf32> to vector<32x1xf32>
      %75 = vector.broadcast %74 : vector<32x1xf32> to vector<32x32xf32>
      %76 = arith.divf %72, %75 : vector<32x32xf32>
      %c0_52 = arith.constant 0 : index
      %c0_53 = arith.constant 0 : index
      %c0_54 = arith.constant 0 : index
      %c0_55 = arith.constant 0 : index
      %77 = vector.load %arg8[%c0_52, %c0_53, %c0_54, %c0_55] : memref<1x2x32x32xf32, #tpu.memory_space<vmem>>, vector<1x1x32x32xf32>
      %78 = vector.shape_cast %77 : vector<1x1x32x32xf32> to vector<32x32xf32>
      %79 = vector.shape_cast %76 : vector<32x32xf32> to vector<1x1x32x32xf32>
      tpu.vector_store %arg8[%c0_52, %c0_53, %c0_54, %c0_55], %79 {strides = array<i32>} : memref<1x2x32x32xf32, #tpu.memory_space<vmem>>, vector<1x1x32x32xf32>,
      %80 = vector.extract_strided_slice %55 {offsets = [0, 32], sizes = [1, 32], strides = [1, 1]} : vector<1x64xf32> to vector<1x32xf32>
      %81 = vector.shape_cast %80 : vector<1x32xf32> to vector<1x32xf32>
      %82 = vector.broadcast %81 : vector<1x32xf32> to vector<32x32xf32>
      %83 = tpu.transpose %82, [1, 0] : vector<32x32xf32> -> vector<32x32xf32>
      %c1_56 = arith.constant 1 : index
      %c0_57 = arith.constant 0 : index
      %c0_58 = arith.constant 0 : index
      %84 = vector.load %arg9[%c1_56, %c0_57, %c0_58] : memref<2x32x32xf32, #tpu.memory_space<vmem>>, vector<1x32x32xf32>
      %85 = vector.shape_cast %84 : vector<1x32x32xf32> to vector<32x32xf32>
      %86 = arith.mulf %85, %83 : vector<32x32xf32>
      %87 = vector.extract_strided_slice %57 {offsets = [0, 32], sizes = [1, 32], strides = [1, 1]} : vector<1x64xf32> to vector<1x32xf32>
      %88 = vector.broadcast %87 : vector<1x32xf32> to vector<32x32xf32>
      %89 = arith.mulf %86, %88 : vector<32x32xf32>
      %cst_59 = arith.constant dense<0xFF800000> : vector<32xf32>
      %90 = vector.multi_reduction <maximumf>, %89, %cst_59 [1] : vector<32x32xf32> to vector<32xf32>
      %91 = vector.shape_cast %90 : vector<32xf32> to vector<32x1xf32>
      %92 = vector.broadcast %91 : vector<32x1xf32> to vector<32x32xf32>
      %93 = arith.subf %89, %92 : vector<32x32xf32>
      %94 = math.exp %93 : vector<32x32xf32>
      %cst_60 = arith.constant dense<0.000000e+00> : vector<32xf32>
      %95 = vector.multi_reduction <add>, %94, %cst_60 [1] : vector<32x32xf32> to vector<32xf32>
      %96 = vector.shape_cast %95 : vector<32xf32> to vector<32x1xf32>
      %97 = vector.broadcast %96 : vector<32x1xf32> to vector<32x32xf32>
      %98 = arith.divf %94, %97 : vector<32x32xf32>
      %c0_61 = arith.constant 0 : index
      %c1_62 = arith.constant 1 : index
      %c0_63 = arith.constant 0 : index
      %c0_64 = arith.constant 0 : index
      %99 = vector.load %arg8[%c0_61, %c1_62, %c0_63, %c0_64] : memref<1x2x32x32xf32, #tpu.memory_space<vmem>>, vector<1x1x32x32xf32>
      %100 = vector.shape_cast %99 : vector<1x1x32x32xf32> to vector<32x32xf32>
      %101 = vector.shape_cast %98 : vector<32x32xf32> to vector<1x1x32x32xf32>
      tpu.vector_store %arg8[%c0_61, %c1_62, %c0_63, %c0_64], %101 {strides = array<i32>} : memref<1x2x32x32xf32, #tpu.memory_space<vmem>>, vector<1x1x32x32xf32>,
    } else {
    }
    return
  }
  func.func @transform_0(%arg0: i32, %arg1: i32) -> (i32, i32, i32) {
    %c0_i32 = arith.constant 0 : i32
    %c0_i32_0 = arith.constant 0 : i32
    return %arg0, %arg1, %c0_i32 : i32, i32, i32
  }
  func.func @transform_1(%arg0: i32, %arg1: i32) -> (i32, i32) {
    %c0_i32 = arith.constant 0 : i32
    %c0_i32_0 = arith.constant 0 : i32
    %c0_i32_1 = arith.constant 0 : i32
    return %c0_i32, %c0_i32_0 : i32, i32
  }
  func.func @transform_2(%arg0: i32, %arg1: i32) -> (i32, i32) {
    %c0_i32 = arith.constant 0 : i32
    %c0_i32_0 = arith.constant 0 : i32
    %c0_i32_1 = arith.constant 0 : i32
    return %c0_i32, %c0_i32_0 : i32, i32
  }
  func.func @transform_3(%arg0: i32, %arg1: i32) -> (i32, i32) {
    %c0_i32 = arith.constant 0 : i32
    %c0_i32_0 = arith.constant 0 : i32
    %c0_i32_1 = arith.constant 0 : i32
    return %c0_i32, %c0_i32_0 : i32, i32
  }
  func.func @transform_4(%arg0: i32, %arg1: i32) -> (i32, i32) {
    %c0_i32 = arith.constant 0 : i32
    %c0_i32_0 = arith.constant 0 : i32
    %c0_i32_1 = arith.constant 0 : i32
    return %c0_i32, %c0_i32_0 : i32, i32
  }
  func.func @transform_5(%arg0: i32, %arg1: i32) -> (i32, i32, i32) {
    %c0_i32 = arith.constant 0 : i32
    %c0_i32_0 = arith.constant 0 : i32
    return %arg0, %arg1, %c0_i32 : i32, i32, i32
  }
  func.func @transform_6(%arg0: i32, %arg1: i32) -> (i32, i32, i32, i32) {
    %c0_i32 = arith.constant 0 : i32
    %c0_i32_0 = arith.constant 0 : i32
    %c0_i32_1 = arith.constant 0 : i32
    %c0_i32_2 = arith.constant 0 : i32
    return %arg0, %c0_i32, %c0_i32_0, %c0_i32_1 : i32, i32, i32, i32
  }
}

</mosaic_0001>

<bundles_post_ra>
// kernel: tpu_custom_call.1
= control target key start
LH: loop header
LB: loop body
LE: loop exit
PB: predicated region body
PF: predicated region fallthrough
CT: control target
= control target key end

     0   :  { %12 = vsyncpa [#allocation6], 0  ;;  %s4345_s0 = inlined_call_operand.vmem [shape: f32[2,256,64], index: 0, kind: input, shape index: {}]   ;;  %s4346_s1 = inlined_call_operand.vmem [shape: f32[64,64], index: 1, kind: input, shape index: {}]   ;;  %s4347_s2 = inlined_call_operand.vmem [shape: f32[64,64], index: 2, kind: input, shape index: {}]   ;;  %s4348_s3 = inlined_call_operand.vmem [shape: f32[64,64], index: 3, kind: input, shape index: {}]   ;;  %s4349_s4 = inlined_call_operand.vmem [shape: f32[1,64], index: 4, kind: input, shape index: {}]   ;;  %s4350_s5 = inlined_call_operand.vmem [shape: f32[2,256,64], index: 5, kind: output, shape index: {0}]   ;;  %s4351_s6 = inlined_call_operand.hbm [shape: f32[2,2,32,32], index: 6, kind: output, shape index: {1}]  }
   0x1   :  { %14 = vsyncpa [#allocation6 + $0x1], 0  ;;  %s3267_s21 = smov 0   ;;  %s3269_s22 = smov 0  }
   0x2   :  { %s3271_s23 = smov 0   ;;  %s3273_s24 = smov 0  }
   0x3   :  { %s3275_s25 = smov 0   ;;  %s3277_s26 = smov 0  }
   0x4 LB: > { %s2321_s27 = sadd.s32 4294967295, %s3225_s26   ;;  %s2322_s28 = sadd.s32 4294967294, %s3225_s26   ;;  %s3225_s26 = sphi %s3277_s26, %s20_s26   ;;  %s3221_s25 = sphi %s3275_s25, %s4364_s25   ;;  %s3217_s24 = sphi %s3273_s24, %s4363_s24   ;;  %s3213_s23 = sphi %s3271_s23, %s4362_s23   ;;  %s3209_s22 = sphi %s3269_s22, %s4361_s22   ;;  %s3205_s21 = sphi %s3267_s21, %s4360_s21  }
   0x5   : > { %s32_s29 = sadd.s32 1, %s3221_s25  ;;  %s179_s30 = sadd.s32 1, %s3213_s23 }
   0x6   : > { %p34_p0 = scmp.ge.s32.totalorder %s32_s29, 2  ;;  %p189_p1 = scmp.ne.s32.totalorder %s3213_s23, %s3209_s22 }
   0x7   : > { %p190_p2 = scmp.eq.s32.totalorder %s2321_s27, 1  ;;  %p195_p3 = scmp.ne.s32.totalorder %s3209_s22, %s3205_s21 }
   0x8   : > { %s4366_s29 = smov (%p34_p0, %s32_s29), 0  ;;  %p196_p5 = scmp.eq.s32.totalorder %s2322_s28, 1 }
   0x9   : > { %p3307_p4 = por %p190_p2, %p189_p1  ;;  %s176_s8 = ssub.s32 %s3221_s25, %s4366_s29 }
   0xa   : > { %p2325_p6 = scmp.ge.s32.totalorder %s3225_s26, 1  ;;  %p177_p7 = scmp.eq.s32.totalorder %s176_s8, 0 }
   0xb   : > { %p3314_p8 = por %p196_p5, %p195_p3  ;;  %p239_p9 = scmp.lt.s32.totalorder %s3225_s26, 3 }
   0xc   : > { %s3320_s10 = scalar_select %p177_p7, %s3213_s23, %s179_s30  }
   0xd   : > { %p240_p10 = pnand %p2325_p6, %p239_p9 }
   0xf   : > { %243 = sbr.rel (%p240_p10) target bundleno = 1081 (0x439), region = 40 }
  0x14   : > { %v357_v0 = vld [vmem:[%s4346_s1 + $0x38] sm:$0xff]  ;;  %v356_v2 = vld [vmem:[%s4346_s1 + $0x30] sm:$0xff]  ;;  %p283_p11 = scmp.lt.s32.totalorder %s3217_s24, 1  ;;  %v355_v4 = vld [vmem:[%s4346_s1 + $0x28] sm:$0xff]  ;;  %vm358_vm0 = vcmask 523264   ;;  %vm315_vm1 = vcmask 516096  }
  0x15   : > { %v687_v1 = vld [vmem:[%s4347_s2 + $0x38] sm:$0xff]  ;;  %2647 = vmatprep.subr.mxu0 %v357_v0  ;;  %v686_v3 = vld [vmem:[%s4347_s2 + $0x30] sm:$0xff]  ;;  %v685_v5 = vld [vmem:[%s4347_s2 + $0x28] sm:$0xff]  ;;  %v4352_v48 = vmov 0.0   ;;  %s3228_s28 = smov 96   ;;  %vm306_vm2 = vcmask 261120  }
  0x16   : > { %2711 = vmatprep.subr.mxu1 %v687_v1  ;;  %2648 = vmatpush3.msra.mxu0 %v357_v0  ;;  %s3342_s30 = scalar_select %p283_p11, %s3217_s24, 1  ;;  %v354_v6 = vld [vmem:[%s4346_s1 + $0x20] sm:$0xff]  ;;  %v353_v8 = vld [vmem:[%s4346_s1 + $0x18] sm:$0xff]  ;;  %v352_v10 = vld [vmem:[%s4346_s1 + $0x10] sm:$0xff]  ;;  %316 = vst.msk [vmem:[#allocation3] sm:$0x1] %vm315_vm1, %v4352_v48 }
  0x17   : > { %2712 = vmatpush3.msra.mxu1 %v687_v1  ;;  %2649 = vmatprep.subr.mxu0 %v356_v2  ;;  %v684_v7 = vld [vmem:[%s4347_s2 + $0x20] sm:$0xff]  ;;  %v683_v9 = vld [vmem:[%s4347_s2 + $0x18] sm:$0xff]  ;;  %v682_v11 = vld [vmem:[%s4347_s2 + $0x10] sm:$0xff]  ;;  %317 = vst.msk [vmem:[#allocation4] sm:$0x1] %vm315_vm1, %v4352_v48  ;;  %s3229_s15 = smov [#allocation5]  }
  0x18   : > { %2713 = vmatprep.subr.mxu1 %v686_v3  ;;  %2650 = vmatpush3.msra.mxu0 %v356_v2  ;;  %s2436_s18 = sshll.u32 %s3342_s30, 8  ;;  %v351_v12 = vld [vmem:[%s4346_s1 + $0x8] sm:$0xff]  ;;  %v350_v14 = vld [vmem:[%s4346_s1] sm:$0xff]  ;;  %s279_s30 = sand.u32 1, %s3209_s22  }
  0x19   : > { %2714 = vmatpush3.msra.mxu1 %v686_v3  ;;  %2651 = vmatprep.subr.mxu0 %v355_v4  ;;  %v681_v13 = vld [vmem:[%s4347_s2 + $0x8] sm:$0xff]  ;;  %s3374_s16 = scalar_lea.vmem %s4345_s0, %s2436_s18  ;;  %v680_v15 = vld [vmem:[%s4347_s2] sm:$0xff]  ;;  %s4176_s20 = scalar_lea.vmem %s4350_s5, %s2436_s18 }
  0x1a   : > { %2715 = vmatprep.subr.mxu1 %v685_v5  ;;  %2652 = vmatpush3.msra.mxu0 %v355_v4  ;;  %v3383_v16 = vld [vmem:[%s3374_s16] sm:$0xff]  ;;  %v319_v17 = vld [vmem:[%s3374_s16 + $0x8] sm:$0xff]  ;;  %v320_v18 = vld [vmem:[%s3374_s16 + $0x10] sm:$0xff]  ;;  %s2326_s18 = sshll.u32 %s279_s30, 6  ;;  %s3153_s17 = sshll.u32 %s3229_s15, 4  ;;  %s3154_s17 = int_to_ptr.vmem [resolvable:$false] %s3153_s17 }
  0x1b   : > { %2716 = vmatpush3.msra.mxu1 %v685_v5  ;;  %2653 = vmatprep.subr.mxu0 %v354_v6  ;;  %v321_v19 = vld [vmem:[%s3374_s16 + $0x18] sm:$0xff]  ;;  %v322_v20 = vld [vmem:[%s3374_s16 + $0x20] sm:$0xff]  ;;  %v323_v21 = vld [vmem:[%s3374_s16 + $0x28] sm:$0xff]  ;;  %s4264_s27 = scalar_lea.vmem [#allocation5], %s2326_s18 }
  0x1c   : > { %2717 = vmatprep.subr.mxu1 %v684_v7  ;;  %2654 = vmatpush3.msra.mxu0 %v354_v6  ;;  %v324_v22 = vld [vmem:[%s3374_s16 + $0x30] sm:$0xff]  ;;  %v325_v23 = vld [vmem:[%s3374_s16 + $0x38] sm:$0xff]  ;;  %v326_v24 = vld [vmem:[%s3374_s16 + $0x40] sm:$0xff]  ;;  %s2208_s8 = sshll.u32 %s4264_s27, 4  ;;  %s4293_s8 = int_to_ptr.vmem [resolvable:$true] %s2208_s8 }
  0x1d   : > { %2718 = vmatpush3.msra.mxu1 %v684_v7  ;;  %2655 = vmatprep.subr.mxu0 %v353_v8  ;;  %v327_v25 = vld [vmem:[%s3374_s16 + $0x48] sm:$0xff]  ;;  %v328_v26 = vld [vmem:[%s3374_s16 + $0x50] sm:$0xff]  ;;  %v329_v27 = vld [vmem:[%s3374_s16 + $0x58] sm:$0xff]  ;;  %s3149_s14 = scalar_lea.vmem %s4293_s8, 1024  ;;  %p3156_p1 = scmp.lt.s32.totalorder %s4293_s8, %s3154_s17 }
  0x1e   : > { %2719 = vmatprep.subr.mxu1 %v683_v9  ;;  %2656 = vmatpush3.msra.mxu0 %v353_v8  ;;  %v330_v28 = vld [vmem:[%s3374_s16 + $0x60] sm:$0xff]  ;;  %v331_v29 = vld [vmem:[%s3374_s16 + $0x68] sm:$0xff]  ;;  %v332_v30 = vld [vmem:[%s3374_s16 + $0x70] sm:$0xff]  ;;  %p3150_p12 = scmp.ne.s32.totalorder %s4293_s8, %s3149_s14 }
  0x1f   : > { %2720 = vmatpush3.msra.mxu1 %v683_v9  ;;  %2657 = vmatprep.subr.mxu0 %v352_v10  ;;  %v333_v31 = vld [vmem:[%s3374_s16 + $0x78] sm:$0xff]  ;;  %v334_v32 = vld [vmem:[%s3374_s16 + $0x80] sm:$0xff]  ;;  %v335_v33 = vld [vmem:[%s3374_s16 + $0x88] sm:$0xff] }
  0x20   : > { %2721 = vmatprep.subr.mxu1 %v682_v11  ;;  %2658 = vmatpush3.msra.mxu0 %v352_v10  ;;  %v336_v34 = vld [vmem:[%s3374_s16 + $0x90] sm:$0xff]  ;;  %v337_v35 = vld [vmem:[%s3374_s16 + $0x98] sm:$0xff]  ;;  %v338_v36 = vld [vmem:[%s3374_s16 + $0xa0] sm:$0xff]  ;;  %p3151_p13 = pnand %p3150_p12, %p3307_p4 }
  0x21   : > { %2722 = vmatpush3.msra.mxu1 %v682_v11  ;;  %2659 = vmatprep.subr.mxu0 %v351_v12  ;;  %v339_v37 = vld [vmem:[%s3374_s16 + $0xa8] sm:$0xff]  ;;  %v340_v38 = vld [vmem:[%s3374_s16 + $0xb0] sm:$0xff]  ;;  %v341_v39 = vld [vmem:[%s3374_s16 + $0xb8] sm:$0xff] }
  0x22   : > { %2723 = vmatprep.subr.mxu1 %v681_v13  ;;  %2660 = vmatpush3.msra.mxu0 %v351_v12  ;;  %v342_v40 = vld [vmem:[%s3374_s16 + $0xc0] sm:$0xff]  ;;  %v343_v41 = vld [vmem:[%s3374_s16 + $0xc8] sm:$0xff]  ;;  %v344_v42 = vld [vmem:[%s3374_s16 + $0xd0] sm:$0xff]  ;;  %p3152_p0 = pneg %p3151_p13 }
  0x23   : > { %2724 = vmatpush3.msra.mxu1 %v681_v13  ;;  %2661 = vmatprep.subr.mxu0 %v350_v14  ;;  %v345_v43 = vld [vmem:[%s3374_s16 + $0xd8] sm:$0xff]  ;;  %v346_v44 = vld [vmem:[%s3374_s16 + $0xe0] sm:$0xff]  ;;  %v347_v45 = vld [vmem:[%s3374_s16 + $0xe8] sm:$0xff] }
  0x24   : > { %2725 = vmatprep.subr.mxu1 %v680_v15  ;;  %2662 = vmatpush3.msra.mxu0 %v350_v14  ;;  %v348_v46 = vld [vmem:[%s3374_s16 + $0xf0] sm:$0xff]  ;;  %v349_v47 = vld [vmem:[%s3374_s16 + $0xf8] sm:$0xff] }
  0x25   : > { %2663 = vmatprep.mubr.msk.f32.mxu0 %vm358_vm0, %v3383_v16  ;;  %2726 = vmatpush3.msra.mxu1 %v680_v15 }
  0x26   : > { %2727 = vmatprep.mubr.msk.f32.mxu1 %vm358_vm0, %v3383_v16  ;;  %2664 = vmatmul.mubr.msk.f32.vlgmr.msra.gmra.mxu0 %vm358_vm0, %v319_v17 }
  0x27   : > { %2728 = vmatmul.mubr.msk.f32.vlgmr.msra.gmra.mxu1 %vm358_vm0, %v319_v17  ;;  %2666 = vmatprep.mubr.msk.f32.mxu0 %vm358_vm0, %v320_v18 }
  0x28   : > { %2730 = vmatprep.mubr.msk.f32.mxu1 %vm358_vm0, %v320_v18 }
  0x2a   : > { %2667 = vmatmul.mubr.msk.f32.gmra.mxu0 %vm358_vm0, %v321_v19 }
  0x2b   : > { %2731 = vmatmul.mubr.msk.f32.gmra.mxu1 %vm358_vm0, %v321_v19  ;;  %2669 = vmatprep.mubr.msk.f32.mxu0 %vm358_vm0, %v322_v20 }
  0x2c   : > { %2733 = vmatprep.mubr.msk.f32.mxu1 %vm358_vm0, %v322_v20 }
  0x2e   : > { %2670 = vmatmul.mubr.msk.f32.gmra.mxu0 %vm358_vm0, %v323_v21 }
  0x2f   : > { %2734 = vmatmul.mubr.msk.f32.gmra.mxu1 %vm358_vm0, %v323_v21  ;;  %2672 = vmatprep.mubr.msk.f32.mxu0 %vm358_vm0, %v324_v22 }
  0x30   : > { %2736 = vmatprep.mubr.msk.f32.mxu1 %vm358_vm0, %v324_v22 }
  0x32   : > { %2673 = vmatmul.mubr.msk.f32.gmra.mxu0 %vm358_vm0, %v325_v23 }
  0x33   : > { %2737 = vmatmul.mubr.msk.f32.gmra.mxu1 %vm358_vm0, %v325_v23  ;;  %2675 = vmatprep.mubr.msk.f32.mxu0 %vm358_vm0, %v326_v24 }
  0x34   : > { %2739 = vmatprep.mubr.msk.f32.mxu1 %vm358_vm0, %v326_v24 }
  0x36   : > { %2676 = vmatmul.mubr.msk.f32.gmra.mxu0 %vm358_vm0, %v327_v25 }
  0x37   : > { %2740 = vmatmul.mubr.msk.f32.gmra.mxu1 %vm358_vm0, %v327_v25  ;;  %2678 = vmatprep.mubr.msk.f32.mxu0 %vm358_vm0, %v328_v26 }
  0x38   : > { %2742 = vmatprep.mubr.msk.f32.mxu1 %vm358_vm0, %v328_v26 }
  0x3a   : > { %2679 = vmatmul.mubr.msk.f32.gmra.mxu0 %vm358_vm0, %v329_v27 }
  0x3b   : > { %2743 = vmatmul.mubr.msk.f32.gmra.mxu1 %vm358_vm0, %v329_v27  ;;  %2681 = vmatprep.mubr.msk.f32.mxu0 %vm358_vm0, %v330_v28 }
  0x3c   : > { %2745 = vmatprep.mubr.msk.f32.mxu1 %vm358_vm0, %v330_v28 }
  0x3e   : > { %2682 = vmatmul.mubr.msk.f32.gmra.mxu0 %vm358_vm0, %v331_v29 }
  0x3f   : > { %2746 = vmatmul.mubr.msk.f32.gmra.mxu1 %vm358_vm0, %v331_v29  ;;  %2684 = vmatprep.mubr.msk.f32.mxu0 %vm358_vm0, %v332_v30 }
  0x40   : > { %2748 = vmatprep.mubr.msk.f32.mxu1 %vm358_vm0, %v332_v30 }
  0x42   : > { %2685 = vmatmul.mubr.msk.f32.gmra.mxu0 %vm358_vm0, %v333_v31 }
  0x43   : > { %2749 = vmatmul.mubr.msk.f32.gmra.mxu1 %vm358_vm0, %v333_v31  ;;  %2687 = vmatprep.mubr.msk.f32.mxu0 %vm358_vm0, %v334_v32 }
  0x44   : > { %2751 = vmatprep.mubr.msk.f32.mxu1 %vm358_vm0, %v334_v32 }
  0x46   : > { %2688 = vmatmul.mubr.msk.f32.gmra.mxu0 %vm358_vm0, %v335_v33 }
  0x47   : > { %2752 = vmatmul.mubr.msk.f32.gmra.mxu1 %vm358_vm0, %v335_v33  ;;  %2690 = vmatprep.mubr.msk.f32.mxu0 %vm358_vm0, %v336_v34 }
  0x48   : > { %2754 = vmatprep.mubr.msk.f32.mxu1 %vm358_vm0, %v336_v34 }
  0x4a   : > { %2691 = vmatmul.mubr.msk.f32.gmra.mxu0 %vm358_vm0, %v337_v35 }
  0x4b   : > { %2755 = vmatmul.mubr.msk.f32.gmra.mxu1 %vm358_vm0, %v337_v35  ;;  %2693 = vmatprep.mubr.msk.f32.mxu0 %vm358_vm0, %v338_v36 }
  0x4c   : > { %2757 = vmatprep.mubr.msk.f32.mxu1 %vm358_vm0, %v338_v36 }
  0x4e   : > { %2694 = vmatmul.mubr.msk.f32.gmra.mxu0 %vm358_vm0, %v339_v37 }
  0x4f   : > { %2758 = vmatmul.mubr.msk.f32.gmra.mxu1 %vm358_vm0, %v339_v37  ;;  %2696 = vmatprep.mubr.msk.f32.mxu0 %vm358_vm0, %v340_v38 }
  0x50   : > { %2760 = vmatprep.mubr.msk.f32.mxu1 %vm358_vm0, %v340_v38 }
  0x52   : > { %2697 = vmatmul.mubr.msk.f32.gmra.mxu0 %vm358_vm0, %v341_v39 }
  0x53   : > { %2761 = vmatmul.mubr.msk.f32.gmra.mxu1 %vm358_vm0, %v341_v39  ;;  %2699 = vmatprep.mubr.msk.f32.mxu0 %vm358_vm0, %v342_v40 }
  0x54   : > { %2763 = vmatprep.mubr.msk.f32.mxu1 %vm358_vm0, %v342_v40 }
  0x56   : > { %2700 = vmatmul.mubr.msk.f32.gmra.mxu0 %vm358_vm0, %v343_v41 }
  0x57   : > { %2764 = vmatmul.mubr.msk.f32.gmra.mxu1 %vm358_vm0, %v343_v41  ;;  %2702 = vmatprep.mubr.msk.f32.mxu0 %vm358_vm0, %v344_v42 }
  0x58   : > { %2766 = vmatprep.mubr.msk.f32.mxu1 %vm358_vm0, %v344_v42 }
  0x5a   : > { %2703 = vmatmul.mubr.msk.f32.gmra.mxu0 %vm358_vm0, %v345_v43 }
  0x5b   : > { %2767 = vmatmul.mubr.msk.f32.gmra.mxu1 %vm358_vm0, %v345_v43  ;;  %2705 = vmatprep.mubr.msk.f32.mxu0 %vm358_vm0, %v346_v44 }
  0x5c   : > { %2769 = vmatprep.mubr.msk.f32.mxu1 %vm358_vm0, %v346_v44 }
  0x5e   : > { %2706 = vmatmul.mubr.msk.f32.gmra.mxu0 %vm358_vm0, %v347_v45 }
  0x5f   : > { %2770 = vmatmul.mubr.msk.f32.gmra.mxu1 %vm358_vm0, %v347_v45  ;;  %2708 = vmatprep.mubr.msk.f32.mxu0 %vm358_vm0, %v348_v46 }
  0x60   : > { %2772 = vmatprep.mubr.msk.f32.mxu1 %vm358_vm0, %v348_v46 }
  0x62   : > { %2709 = vmatmul.mubr.msk.f32.gmra.mxu0 %vm358_vm0, %v349_v47 }
  0x63   : > { %2773 = vmatmul.mubr.msk.f32.gmra.mxu1 %vm358_vm0, %v349_v47  ;;  %2791 = vmatprep.mubr.msk.f32.mxu0 %vm358_vm0, %v3383_v16 }
  0xe6   : > { %v3488_v49 = vpop.f32.mrf.mxu0 }
  0xe7   : > { %v3490_v50 = vpop.f32.mrf.mxu1  ;;  %v1180_v51 = vmul.f32 %v3488_v49, %v3488_v49 }
  0xe8   : > { %v3494_v52 = vpop.f32.mrf.mxu0  ;;  %v1285_v54 = vmul.f32 %v3490_v50, %v3490_v50 }
  0xe9   : > { %v3496_v53 = vpop.f32.mrf.mxu1  ;;  %v1179_v55 = vmul.f32 %v3494_v52, %v3494_v52  ;;  %v1212_v59 = vsel %vm358_vm0, %v1180_v51, 0.0 }
  0xea   : > { %v1284_v56 = vmul.f32 %v3496_v53, %v3496_v53  ;;  %v3504_v57 = vpop.f32.mrf.mxu0  ;;  %v1317_v1 = vsel %vm358_vm0, %v1285_v54, 0.0 }
  0xeb   : > { %v3506_v58 = vpop.f32.mrf.mxu1  ;;  %v1211_v60 = vsel %vm358_vm0, %v1179_v55, 0.0  ;;  %v1182_v62 = vmul.f32 %v3504_v57, %v3504_v57 }
  0xec   : > { %v1316_v61 = vsel %vm358_vm0, %v1284_v56, 0.0  ;;  %v3513_v63 = vpop.f32.mrf.mxu0  ;;  %v1287_v2 = vmul.f32 %v3506_v58, %v3506_v58  ;;  %v1213_v5 = vadd.f32 %v1212_v59, %v1211_v60 }
  0xed   : > { %v3515_v0 = vpop.f32.mrf.mxu1  ;;  %v1181_v3 = vmul.f32 %v3513_v63, %v3513_v63  ;;  %v1318_v6 = vadd.f32 %v1317_v1, %v1316_v61  ;;  %v1216_v11 = vsel %vm358_vm0, %v1182_v62, 0.0 }
  0xee   : > { %v1286_v4 = vmul.f32 %v3515_v0, %v3515_v0  ;;  %v3524_v7 = vpop.f32.mrf.mxu0  ;;  %v1321_v17 = vsel %vm358_vm0, %v1287_v2, 0.0 }
  0xef   : > { %v3526_v8 = vpop.f32.mrf.mxu1  ;;  %v1214_v9 = vsel %vm358_vm0, %v1181_v3, 0.0  ;;  %1788 = vrot.lane.b32.xlu1 %v3524_v7, %s3228_s28  ;;  %v1184_v14 = vmul.f32 %v3524_v7, %v3524_v7 }
  0xf0   : > { %v1319_v10 = vsel %vm358_vm0, %v1286_v4, 0.0  ;;  %v1215_v12 = vadd.f32 %v1214_v9, %v1213_v5  ;;  %v3535_v15 = vpop.f32.mrf.mxu0  ;;  %v1289_v18 = vmul.f32 %v3526_v8, %v3526_v8 }
  0xf1   : > { %v1320_v13 = vadd.f32 %v1319_v10, %v1318_v6  ;;  %v3537_v16 = vpop.f32.mrf.mxu1  ;;  %v1183_v19 = vmul.f32 %v3535_v15, %v3535_v15  ;;  %v1220_v28 = vsel %vm358_vm0, %v1184_v14, 0.0 }
  0xf2   : > { %v1288_v20 = vmul.f32 %v3537_v16, %v3537_v16  ;;  %v1217_v21 = vadd.f32 %v1216_v11, %v1215_v12  ;;  %v3546_v23 = vpop.f32.mrf.mxu0  ;;  %v1325_v33 = vsel %vm358_vm0, %v1289_v18, 0.0 }
  0xf3   : > { %v1322_v22 = vadd.f32 %v1321_v17, %v1320_v13  ;;  %v3548_v24 = vpop.f32.mrf.mxu1  ;;  %v1218_v25 = vsel %vm358_vm0, %v1183_v19, 0.0  ;;  %v1186_v27 = vmul.f32 %v3546_v23, %v3546_v23  ;;  %1786 = vrot.lane.b32.xlu1 %v3535_v15, %s3228_s28 }
  0xf4   : > { %v1323_v26 = vsel %vm358_vm0, %v1288_v20, 0.0  ;;  %v1219_v29 = vadd.f32 %v1218_v25, %v1217_v21  ;;  %v3557_v31 = vpop.f32.mrf.mxu0  ;;  %v1291_v34 = vmul.f32 %v3548_v24, %v3548_v24 }
  0xf5   : > { %v1324_v30 = vadd.f32 %v1323_v26, %v1322_v22  ;;  %v3559_v32 = vpop.f32.mrf.mxu1  ;;  %v1185_v35 = vmul.f32 %v3557_v31, %v3557_v31  ;;  %v1224_v41 = vsel %vm358_vm0, %v1186_v27, 0.0 }
  0xf6   : > { %v1290_v36 = vmul.f32 %v3559_v32, %v3559_v32  ;;  %v1221_v37 = vadd.f32 %v1220_v28, %v1219_v29  ;;  %v3568_v39 = vpop.f32.mrf.mxu0  ;;  %v1329_v54 = vsel %vm358_vm0, %v1291_v34, 0.0 }
  0xf7   : > { %v1326_v38 = vadd.f32 %v1325_v33, %v1324_v30  ;;  %v3570_v40 = vpop.f32.mrf.mxu1  ;;  %v1222_v42 = vsel %vm358_vm0, %v1185_v35, 0.0  ;;  %v1188_v44 = vmul.f32 %v3568_v39, %v3568_v39  ;;  %1792 = vrot.lane.b32.xlu1 %v3546_v23, %s3228_s28 }
  0xf8   : > { %v1327_v43 = vsel %vm358_vm0, %v1290_v36, 0.0  ;;  %v1223_v45 = vadd.f32 %v1222_v42, %v1221_v37  ;;  %v3579_v47 = vpop.f32.mrf.mxu0  ;;  %v1293_v55 = vmul.f32 %v3570_v40, %v3570_v40 }
  0xf9   : > { %v1328_v46 = vadd.f32 %v1327_v43, %v1326_v38  ;;  %v3581_v51 = vpop.f32.mrf.mxu1  ;;  %v1187_v56 = vmul.f32 %v3579_v47, %v3579_v47  ;;  %v1228_v2 = vsel %vm358_vm0, %v1188_v44, 0.0 }
  0xfa   : > { %v1292_v59 = vmul.f32 %v3581_v51, %v3581_v51  ;;  %v1225_v60 = vadd.f32 %v1224_v41, %v1223_v45  ;;  %v3590_v62 = vpop.f32.mrf.mxu0  ;;  %v1333_v12 = vsel %vm358_vm0, %v1293_v55, 0.0 }
  0xfb   : > { %v1330_v61 = vadd.f32 %v1329_v54, %v1328_v46  ;;  %v3592_v1 = vpop.f32.mrf.mxu1  ;;  %v1226_v3 = vsel %vm358_vm0, %v1187_v56, 0.0  ;;  %v1190_v5 = vmul.f32 %v3590_v62, %v3590_v62  ;;  %1790 = vrot.lane.b32.xlu1 %v3557_v31, %s3228_s28 }
  0xfc   : > { %v1331_v4 = vsel %vm358_vm0, %v1292_v59, 0.0  ;;  %v1227_v6 = vadd.f32 %v1226_v3, %v1225_v60  ;;  %v3601_v10 = vpop.f32.mrf.mxu0  ;;  %v1295_v13 = vmul.f32 %v3592_v1, %v3592_v1 }
  0xfd   : > { %v1332_v9 = vadd.f32 %v1331_v4, %v1330_v61  ;;  %v3603_v11 = vpop.f32.mrf.mxu1  ;;  %v1189_v14 = vmul.f32 %v3601_v10, %v3601_v10  ;;  %v1232_v22 = vsel %vm358_vm0, %v1190_v5, 0.0 }
  0xfe   : > { %v1294_v17 = vmul.f32 %v3603_v11, %v3603_v11  ;;  %v1229_v18 = vadd.f32 %v1228_v2, %v1227_v6  ;;  %v3612_v20 = vpop.f32.mrf.mxu0  ;;  %v1337_v34 = vsel %vm358_vm0, %v1295_v13, 0.0 }
  0xff   : > { %v1334_v19 = vadd.f32 %v1333_v12, %v1332_v9  ;;  %v3614_v21 = vpop.f32.mrf.mxu1  ;;  %v1230_v25 = vsel %vm358_vm0, %v1189_v14, 0.0  ;;  %v1192_v27 = vmul.f32 %v3612_v20, %v3612_v20  ;;  %1796 = vrot.lane.b32.xlu1 %v3568_v39, %s3228_s28 }
 0x100   : > { %v1335_v26 = vsel %vm358_vm0, %v1294_v17, 0.0  ;;  %v1231_v28 = vadd.f32 %v1230_v25, %v1229_v18  ;;  %v3623_v30 = vpop.f32.mrf.mxu0  ;;  %v1297_v35 = vmul.f32 %v3614_v21, %v3614_v21 }
 0x101   : > { %v1336_v29 = vadd.f32 %v1335_v26, %v1334_v19  ;;  %v3625_v33 = vpop.f32.mrf.mxu1  ;;  %v1191_v36 = vmul.f32 %v3623_v30, %v3623_v30  ;;  %v1236_v44 = vsel %vm358_vm0, %v1192_v27, 0.0 }
 0x102   : > { %v1296_v37 = vmul.f32 %v3625_v33, %v3625_v33  ;;  %v1233_v38 = vadd.f32 %v1232_v22, %v1231_v28  ;;  %v3634_v42 = vpop.f32.mrf.mxu0  ;;  %v1341_v61 = vsel %vm358_vm0, %v1297_v35, 0.0 }
 0x103   : > { %v1338_v41 = vadd.f32 %v1337_v34, %v1336_v29  ;;  %v3636_v43 = vpop.f32.mrf.mxu1  ;;  %v1234_v45 = vsel %vm358_vm0, %v1191_v36, 0.0  ;;  %v1194_v54 = vmul.f32 %v3634_v42, %v3634_v42  ;;  %1794 = vrot.lane.b32.xlu1 %v3579_v47, %s3228_s28 }
 0x104   : > { %v1339_v46 = vsel %vm358_vm0, %v1296_v37, 0.0  ;;  %v1235_v55 = vadd.f32 %v1234_v45, %v1233_v38  ;;  %v3645_v59 = vpop.f32.mrf.mxu0  ;;  %v1299_v2 = vmul.f32 %v3636_v43, %v3636_v43 }
 0x105   : > { %v1340_v56 = vadd.f32 %v1339_v46, %v1338_v41  ;;  %v3647_v60 = vpop.f32.mrf.mxu1  ;;  %v1193_v3 = vmul.f32 %v3645_v59, %v3645_v59  ;;  %v1240_v5 = vsel %vm358_vm0, %v1194_v54, 0.0 }
 0x106   : > { %v1298_v4 = vmul.f32 %v3647_v60, %v3647_v60  ;;  %v1237_v6 = vadd.f32 %v1236_v44, %v1235_v55  ;;  %v3657_v12 = vpop.f32.mrf.mxu0  ;;  %v1345_v28 = vsel %vm358_vm0, %v1299_v2, 0.0 }
 0x107   : > { %v1342_v9 = vadd.f32 %v1341_v61, %v1340_v56  ;;  %v2753_v13 = vpop.f32.mrf.mxu1  ;;  %v1238_v14 = vsel %vm358_vm0, %v1193_v3, 0.0  ;;  %v1196_v18 = vmul.f32 %v3657_v12, %v3657_v12  ;;  %1800 = vrot.lane.b32.xlu1 %v3590_v62, %s3228_s28 }
 0x108   : > { %v1343_v17 = vsel %vm358_vm0, %v1298_v4, 0.0  ;;  %v3664_v19 = vpack.i.bf16 %v3490_v50, %v2753_v13  ;;  %v1239_v22 = vadd.f32 %v1238_v14, %v1237_v6  ;;  %v3668_v26 = vpop.f32.mrf.mxu0  ;;  %v1301_v29 = vmul.f32 %v2753_v13, %v2753_v13 }
 0x109   : > { %v1344_v25 = vadd.f32 %v1343_v17, %v1342_v9  ;;  %v834_v27 = vpop.f32.mrf.mxu1  ;;  %v1195_v34 = vmul.f32 %v3668_v26, %v3668_v26  ;;  %v1244_v36 = vsel %vm358_vm0, %v1196_v18, 0.0 }
 0x10a   : > { %v1300_v35 = vmul.f32 %v834_v27, %v834_v27  ;;  %v1241_v37 = vadd.f32 %v1240_v5, %v1239_v22  ;;  %2899 = vrot.lane.b32.xlu0 %v3664_v19, %s3228_s28  ;;  %v3676_v38 = vpop.f32.mrf.mxu0  ;;  %v3679_v44 = vpack.i.bf16 %v3496_v53, %v834_v27  ;;  %v1349_v4 = vsel %vm358_vm0, %v1301_v29, 0.0 }
 0x10b   : > { %v1346_v50 = vadd.f32 %v1345_v28, %v1344_v25  ;;  %v2756_v41 = vpop.f32.mrf.mxu1  ;;  %v1242_v45 = vsel %vm358_vm0, %v1195_v34, 0.0  ;;  %v1198_v54 = vmul.f32 %v3676_v38, %v3676_v38  ;;  %1798 = vrot.lane.b32.xlu1 %v3601_v10, %s3228_s28 }
 0x10c   : > { %v1347_v46 = vsel %vm358_vm0, %v1300_v35, 0.0  ;;  %v3686_v55 = vpack.i.bf16 %v3506_v58, %v2756_v41  ;;  %v1243_v56 = vadd.f32 %v1242_v45, %v1241_v37  ;;  %v1303_v2 = vmul.f32 %v2756_v41, %v2756_v41  ;;  %v3690_v3 = vpop.f32.mrf.mxu0 }
 0x10d   : > { %v1348_v61 = vadd.f32 %v1347_v46, %v1346_v50  ;;  %v844_v53 = vpop.f32.mrf.mxu1  ;;  %v1197_v5 = vmul.f32 %v3690_v3, %v3690_v3  ;;  %v1248_v18 = vsel %vm358_vm0, %v1198_v54, 0.0 }
 0x10e   : > { %v3696_v6 = vpack.i.bf16 %v3515_v0, %v844_v53  ;;  %v1245_v9 = vadd.f32 %v1244_v36, %v1243_v56  ;;  %v1302_v13 = vmul.f32 %v844_v53, %v844_v53  ;;  %2904 = vrot.lane.b32.xlu0 %v3679_v44, %s3228_s28  ;;  %v3700_v14 = vpop.f32.mrf.mxu0  ;;  %v1353_v0 = vsel %vm358_vm0, %v1303_v2, 0.0 }
 0x10f   : > { %v1350_v58 = vadd.f32 %v1349_v4, %v1348_v61  ;;  %v2759_v17 = vpop.f32.mrf.mxu1  ;;  %v1246_v22 = vsel %vm358_vm0, %v1197_v5, 0.0  ;;  %v1200_v25 = vmul.f32 %v3700_v14, %v3700_v14  ;;  %1804 = vrot.lane.b32.xlu1 %v3612_v20, %s3228_s28 }
 0x110   : > { %v3707_v27 = vpack.i.bf16 %v3526_v8, %v2759_v17  ;;  %v1247_v28 = vadd.f32 %v1246_v22, %v1245_v9  ;;  %v1351_v29 = vsel %vm358_vm0, %v1302_v13, 0.0  ;;  %v1305_v34 = vmul.f32 %v2759_v17, %v2759_v17  ;;  %v3713_v35 = vpop.f32.mrf.mxu0 }
 0x111   : > { %v854_v36 = vpop.f32.mrf.mxu1  ;;  %v1352_v37 = vadd.f32 %v1351_v29, %v1350_v58  ;;  %v1199_v50 = vmul.f32 %v3713_v35, %v3713_v35  ;;  %v1252_v8 = vsel %vm358_vm0, %v1200_v25, 0.0 }
 0x112   : > { %v3718_v41 = vpack.i.bf16 %v3537_v16, %v854_v36  ;;  %v1249_v45 = vadd.f32 %v1248_v18, %v1247_v28  ;;  %v1304_v46 = vmul.f32 %v854_v36, %v854_v36  ;;  %1816 = vrot.lane.b32.xlu0 %v3676_v38, %s3228_s28  ;;  %v3723_v54 = vpop.f32.mrf.mxu0  ;;  %v1357_v16 = vsel %vm358_vm0, %v1305_v34, 0.0 }
 0x113   : > { %v2762_v56 = vpop.f32.mrf.mxu1  ;;  %v1250_v61 = vsel %vm358_vm0, %v1199_v50, 0.0  ;;  %v1354_v2 = vadd.f32 %v1353_v0, %v1352_v37  ;;  %v1202_v53 = vmul.f32 %v3723_v54, %v3723_v54  ;;  %1802 = vrot.lane.b32.xlu1 %v3623_v30, %s3228_s28 }
 0x114   : > { %4357 = vst [vmem:[#allocation8_spill] sm:$0xff] %v3718_v41  ;;  %v3729_v4 = vpack.i.bf16 %v3548_v24, %v2762_v56  ;;  %v1251_v5 = vadd.f32 %v1250_v61, %v1249_v45  ;;  %v1355_v9 = vsel %vm358_vm0, %v1304_v46, 0.0  ;;  %v1307_v58 = vmul.f32 %v2762_v56, %v2762_v56  ;;  %v3735_v13 = vpop.f32.mrf.mxu0 }
 0x115   : > { %v864_v17 = vpop.f32.mrf.mxu1  ;;  %v1356_v18 = vadd.f32 %v1355_v9, %v1354_v2  ;;  %v1201_v22 = vmul.f32 %v3735_v13, %v3735_v13  ;;  %v1256_v24 = vsel %vm358_vm0, %v1202_v53, 0.0 }
 0x116   : > { %v3740_v25 = vpack.i.bf16 %v3559_v32, %v864_v17  ;;  %v1253_v0 = vadd.f32 %v1252_v8, %v1251_v5  ;;  %v1306_v28 = vmul.f32 %v864_v17, %v864_v17  ;;  %1820 = vrot.lane.b32.xlu0 %v3700_v14, %s3228_s28  ;;  %v3745_v29 = vpop.f32.mrf.mxu0  ;;  %v1361_v32 = vsel %vm358_vm0, %v1307_v58, 0.0 }
 0x117   : > { %v2765_v34 = vpop.f32.mrf.mxu1  ;;  %v1254_v36 = vsel %vm358_vm0, %v1201_v22, 0.0  ;;  %v1358_v37 = vadd.f32 %v1357_v16, %v1356_v18  ;;  %v1204_v50 = vmul.f32 %v3745_v29, %v3745_v29  ;;  %1808 = vrot.lane.b32.xlu1 %v3634_v42, %s3228_s28 }
 0x118   : > { %v3751_v45 = vpack.i.bf16 %v3570_v40, %v2765_v34  ;;  %v1255_v8 = vadd.f32 %v1254_v36, %v1253_v0  ;;  %v1359_v46 = vsel %vm358_vm0, %v1306_v28, 0.0  ;;  %v1309_v56 = vmul.f32 %v2765_v34, %v2765_v34  ;;  %v3757_v61 = vpop.f32.mrf.mxu0 }
 0x119   : > { %v874_v2 = vpop.f32.mrf.mxu1  ;;  %v1360_v53 = vadd.f32 %v1359_v46, %v1358_v37  ;;  %v1203_v16 = vmul.f32 %v3757_v61, %v3757_v61  ;;  %v1260_v40 = vsel %vm358_vm0, %v1204_v50, 0.0 }
 0x11a   : > { %v3762_v5 = vpack.i.bf16 %v3581_v51, %v874_v2  ;;  %v1257_v9 = vadd.f32 %v1256_v24, %v1255_v8  ;;  %v1308_v17 = vmul.f32 %v874_v2, %v874_v2  ;;  %2924 = vrot.lane.b32.xlu0 %v3718_v41, %s3228_s28  ;;  %v3767_v58 = vpop.f32.mrf.mxu0  ;;  %v1365_v51 = vsel %vm358_vm0, %v1309_v56, 0.0 }
 0x11b   : > { %v2768_v18 = vpop.f32.mrf.mxu1  ;;  %v1258_v22 = vsel %vm358_vm0, %v1203_v16, 0.0  ;;  %v1362_v0 = vadd.f32 %v1361_v32, %v1360_v53  ;;  %v1206_v28 = vmul.f32 %v3767_v58, %v3767_v58  ;;  %1806 = vrot.lane.b32.xlu1 %v3645_v59, %s3228_s28 }
 0x11c   : > { %v3773_v34 = vpack.i.bf16 %v3592_v1, %v2768_v18  ;;  %v1259_v24 = vadd.f32 %v1258_v22, %v1257_v9  ;;  %v1363_v36 = vsel %vm358_vm0, %v1308_v17, 0.0  ;;  %v1311_v37 = vmul.f32 %v2768_v18, %v2768_v18  ;;  %v3779_v50 = vpop.f32.mrf.mxu0 }
 0x11d   : > { %v884_v8 = vpop.f32.mrf.mxu1  ;;  %v1364_v46 = vadd.f32 %v1363_v36, %v1362_v0  ;;  %v1205_v32 = vmul.f32 %v3779_v50, %v3779_v50  ;;  %v1264_v1 = vsel %vm358_vm0, %v1206_v28, 0.0 }
 0x11e   : > { %v3784_v2 = vpack.i.bf16 %v3603_v11, %v884_v8  ;;  %v1261_v53 = vadd.f32 %v1260_v40, %v1259_v24  ;;  %v1310_v16 = vmul.f32 %v884_v8, %v884_v8  ;;  %1818 = vrot.lane.b32.xlu0 %v3713_v35, %s3228_s28  ;;  %v3789_v56 = vpop.f32.mrf.mxu0  ;;  %v1369_v11 = vsel %vm358_vm0, %v1311_v37, 0.0 }
 0x11f   : > { %v2771_v9 = vpop.f32.mrf.mxu1  ;;  %v1262_v17 = vsel %vm358_vm0, %v1205_v32, 0.0  ;;  %v1366_v18 = vadd.f32 %v1365_v51, %v1364_v46  ;;  %v1208_v22 = vmul.f32 %v3789_v56, %v3789_v56  ;;  %2909 = vrot.lane.b32.xlu1 %v3686_v55, %s3228_s28 }
 0x120   : > { %v3795_v0 = vpack.i.bf16 %v3614_v21, %v2771_v9  ;;  %v1263_v40 = vadd.f32 %v1262_v17, %v1261_v53  ;;  %v1367_v28 = vsel %vm358_vm0, %v1310_v16, 0.0  ;;  %v1313_v24 = vmul.f32 %v2771_v9, %v2771_v9  ;;  %v3801_v36 = vpop.f32.mrf.mxu0 }
 0x121   : > { %v894_v8 = vpop.f32.mrf.mxu1  ;;  %v1368_v32 = vadd.f32 %v1367_v28, %v1366_v18  ;;  %v1207_v51 = vmul.f32 %v3801_v36, %v3801_v36  ;;  %v1268_v21 = vsel %vm358_vm0, %v1208_v22, 0.0 }
 0x122   : > { %v3806_v46 = vpack.i.bf16 %v3625_v33, %v894_v8  ;;  %v1265_v48 = vadd.f32 %v1264_v1, %v1263_v40  ;;  %v1312_v41 = vmul.f32 %v894_v8, %v894_v8  ;;  %1824 = vrot.lane.b32.xlu0 %v3723_v54, %s3228_s28  ;;  %v3811_v37 = vpop.f32.mrf.mxu0  ;;  %v1373_v33 = vsel %vm358_vm0, %v1313_v24, 0.0 }
 0x123   : > { %v2774_v53 = vpop.f32.mrf.mxu1  ;;  %v1266_v16 = vsel %vm358_vm0, %v1207_v51, 0.0  ;;  %v1370_v9 = vadd.f32 %v1369_v11, %v1368_v32  ;;  %v1210_v17 = vmul.f32 %v3811_v37, %v3811_v37  ;;  %2914 = vrot.lane.b32.xlu1 %v3696_v6, %s3228_s28  ;;  %2559 = vmatprep.subr.mxu1 %v3811_v37 }
 0x124   : > { %v3817_v18 = vpack.i.bf16 %v3636_v43, %v2774_v53  ;;  %v1267_v1 = vadd.f32 %v1266_v16, %v1265_v48  ;;  %v1371_v22 = vsel %vm358_vm0, %v1312_v41, 0.0  ;;  %v1315_v40 = vmul.f32 %v2774_v53, %v2774_v53  ;;  %v3824_v28 = vpop.f32.mrf.mxu0  ;;  %2560 = vmatpush3.msra.mxu1 %v3634_v42 }
 0x125   : > { %v3826_v11 = vpop.f32.mrf.mxu1  ;;  %v1372_v8 = vadd.f32 %v1371_v22, %v1370_v9  ;;  %v1209_v43 = vmul.f32 %v3824_v28, %v3824_v28  ;;  %2561 = vmatprep.subr.mxu1 %v3824_v28  ;;  %v1272_v48 = vsel %vm358_vm0, %v1210_v17, 0.0 }
 0x126   : > { %v1269_v32 = vadd.f32 %v1268_v21, %v1267_v1  ;;  %v1314_v24 = vmul.f32 %v3826_v11, %v3826_v11  ;;  %2934 = vrot.lane.b32.xlu0 %v3740_v25, %s3228_s28  ;;  %2562 = vmatpush3.msra.mxu1 %v3645_v59  ;;  %v1377_v51 = vsel %vm358_vm0, %v1315_v40, 0.0 }
 0x127   : > { %v1270_v41 = vsel %vm358_vm0, %v1209_v43, 0.0  ;;  %v1374_v42 = vadd.f32 %v1373_v33, %v1372_v8  ;;  %2919 = vrot.lane.b32.xlu1 %v3707_v27, %s3228_s28  ;;  %2563 = vmatprep.subr.mxu1 %v3789_v56  ;;  %v1283_v43 = vld [vmem:[#allocation4] sm:$0x1] }
 0x128   : > { %v1271_v21 = vadd.f32 %v1270_v41, %v1269_v32  ;;  %v1375_v53 = vsel %vm358_vm0, %v1314_v24, 0.0  ;;  %2564 = vmatpush3.msra.mxu1 %v3612_v20 }
 0x129   : > { %v1376_v16 = vadd.f32 %v1375_v53, %v1374_v42  ;;  %2565 = vmatprep.subr.mxu1 %v3801_v36 }
 0x12a   : > { %v1273_v59 = vadd.f32 %v1272_v48, %v1271_v21  ;;  %1822 = vrot.lane.b32.xlu0 %v3735_v13, %s3228_s28  ;;  %2566 = vmatpush3.msra.mxu1 %v3623_v30 }
 0x12b   : > { %v1378_v9 = vadd.f32 %v1377_v51, %v1376_v16  ;;  %2929 = vrot.lane.b32.xlu1 %v3729_v4, %s3228_s28  ;;  %2567 = vmatprep.subr.mxu1 %v3767_v58 }
 0x12c   : > { %v1274_v17 = vrot.slane %v1273_v59, 4  ;;  %2568 = vmatpush3.msra.mxu1 %v3590_v62 }
 0x12d   : > { %v1379_v33 = vrot.slane %v1378_v9, 4  ;;  %2569 = vmatprep.subr.mxu1 %v3779_v50 }
 0x12e   : > { %v1275_v20 = vadd.f32 %v1274_v17, %v1273_v59  ;;  %1828 = vrot.lane.b32.xlu0 %v3745_v29, %s3228_s28  ;;  %2570 = vmatpush3.msra.mxu1 %v3601_v10 }
 0x12f   : > { %v1380_v1 = vadd.f32 %v1379_v33, %v1378_v9  ;;  %2939 = vrot.lane.b32.xlu1 %v3751_v45, %s3228_s28  ;;  %2571 = vmatprep.subr.mxu1 %v3745_v29  ;;  %v1178_v29 = vld [vmem:[#allocation3] sm:$0x1] }
 0x130   : > { %v1276_v30 = vrot.slane %v1275_v20, 2  ;;  %2572 = vmatpush3.msra.mxu1 %v3568_v39 }
 0x131   : > { %v1381_v22 = vrot.slane %v1380_v1, 2  ;;  %2573 = vmatprep.subr.mxu1 %v3757_v61 }
 0x132   : > { %v1277_v62 = vadd.f32 %v1276_v30, %v1275_v20  ;;  %2944 = vrot.lane.b32.xlu0 %v3762_v5, %s3228_s28  ;;  %2574 = vmatpush3.msra.mxu1 %v3579_v47 }
 0x133   : > { %v1382_v40 = vadd.f32 %v1381_v22, %v1380_v1  ;;  %2949 = vrot.lane.b32.xlu1 %v3773_v34, %s3228_s28  ;;  %2575 = vmatprep.subr.mxu1 %v3723_v54 }
 0x134   : > { %v1278_v10 = vrot.slane %v1277_v62, 1  ;;  %2576 = vmatpush3.msra.mxu1 %v3546_v23 }
 0x135   : > { %v1383_v39 = vrot.slane %v1382_v40, 1  ;;  %2577 = vmatprep.subr.mxu1 %v3735_v13 }
 0x136   : > { %v1279_v8 = vadd.f32 %v1278_v10, %v1277_v62  ;;  %1826 = vrot.lane.b32.xlu0 %v3757_v61, %s3228_s28  ;;  %2578 = vmatpush3.msra.mxu1 %v3557_v31 }
 0x137   : > { %v1384_v47 = vadd.f32 %v1383_v39, %v1382_v40  ;;  %2959 = vrot.lane.b32.xlu1 %v3795_v0, %s3228_s28  ;;  %2579 = vmatprep.subr.mxu1 %v3700_v14 }
 0x138   : > { %v1280_v54 = vadd.f32 %v1279_v8, %v1178_v29  ;;  %2580 = vmatpush3.msra.mxu1 %v3524_v7  ;;  %v2973_v7 = vpack.i.bf16 %v3647_v60, %v3826_v11  ;;  %v1979_v11 = vlaneseq }
 0x139   : > { %v1385_v23 = vadd.f32 %v1384_v47, %v1283_v43  ;;  %2581 = vmatprep.subr.mxu1 %v3713_v35 }
 0x13a   : > { %1282 = vst.msk [vmem:[#allocation3] sm:$0x1] %vm315_vm1, %v1280_v54  ;;  %1832 = vrot.lane.b32.xlu0 %v3767_v58, %s3228_s28  ;;  %2582 = vmatpush3.msra.mxu1 %v3535_v15  ;;  %v3977_v24 = vshrl.u32 %v1979_v11, 7  ;;  %v3120_v11 = vld [vmem:[%s3374_s16 + $0x18] sm:$0xff] }
 0x13b   : > { %1386 = vst.msk [vmem:[#allocation4] sm:$0x1] %vm315_vm1, %v1385_v23  ;;  %2969 = vrot.lane.b32.xlu1 %v3817_v18, %s3228_s28  ;;  %2583 = vmatprep.subr.mxu1 %v3676_v38 }
 0x13c   : > { %2584 = vmatpush3.msra.mxu1 %v3504_v57  ;;  %v1981_v41 = vsub.s32 0, %v3977_v24  ;;  %v3122_v24 = vld [vmem:[%s3374_s16 + $0x28] sm:$0xff] }
 0x13d   : > { %2585 = vmatprep.subr.mxu1 %v3690_v3 }
 0x13e   : > { %2954 = vrot.lane.b32.xlu0 %v3784_v2, %s3228_s28  ;;  %2586 = vmatpush3.msra.mxu1 %v3513_v63 }
 0x13f   : > { %2587 = vmatprep.subr.mxu1 %v3657_v12 }
 0x140   : > { %2588 = vmatpush3.msra.mxu1 %v3488_v49 }
 0x141   : > { %2589 = vmatprep.subr.mxu1 %v3668_v26  ;;  %v1970_v20 = vld [vmem:[#allocation3] sm:$0x1] }
 0x142   : > { %1830 = vrot.lane.b32.xlu0 %v3779_v50, %s3228_s28  ;;  %2590 = vmatpush3.msra.mxu1 %v3494_v52  ;;  %v1971_v22 = vmax.f32 %v1970_v20, 1e-24  ;;  %v3135_v20 = vld [vmem:[%s3374_s16 + $0x90] sm:$0xff] }
 0x146   : > { %1836 = vrot.lane.b32.xlu0 %v3789_v56, %s3228_s28 }
 0x14a   : > { %2964 = vrot.lane.b32.xlu0 %v3806_v46, %s3228_s28 }
 0x14e   : > { %1834 = vrot.lane.b32.xlu0 %v3801_v36, %s3228_s28 }
 0x152   : > { %1840 = vrot.lane.b32.xlu0 %v3811_v37, %s3228_s28 }
 0x156   : > { %2974 = vrot.lane.b32.xlu0 %v2973_v7, %s3228_s28 }
 0x15a   : > { %1838 = vrot.lane.b32.xlu0 %v3824_v28, %s3228_s28 }
 0x15e   : > { %1784 = vrot.lane.b32.xlu0 %v3504_v57, %s3228_s28 }
 0x161   : > { %v3912_v15 = vpop.permute.xlu1 %1788 }
 0x162   : > { %1814 = vrot.lane.b32.xlu0 %v3690_v3, %s3228_s28 }
 0x164   : > { %2979 = vxpose.xlu1.b32.start [1/16] (narrow) %v3679_v44, 32 }
 0x165   : > { %v3917_v31 = vpop.permute.xlu1 %1786 }
 0x166   : > { %1782 = vrot.lane.b32.xlu0 %v3513_v63, %s3228_s28  ;;  %v4358_v63 = vld [vmem:[#allocation8_spill] sm:$0xff] }
 0x168   : > { %2981 = vxpose.xlu1.b32.cont [2/16] (narrow) %v3664_v19, 32 }
 0x169   : > { %v3922_v60 = vpop.permute.xlu1 %1792 }
 0x16a   : > { %1812 = vrot.lane.b32.xlu0 %v3657_v12, %s3228_s28 }
 0x16c   : > { %2983 = vxpose.xlu1.b32.cont [3/16] (narrow) %v3696_v6, 32 }
 0x16d   : > { %v3927_v57 = vpop.permute.xlu1 %1790 }
 0x16e   : > { %1780 = vrot.lane.b32.xlu0 %v3488_v49, %s3228_s28 }
 0x170   : > { %2985 = vxpose.xlu1.b32.cont [4/16] (narrow) %v3686_v55, 32 }
 0x171   : > { %v3932_v38 = vpop.permute.xlu1 %1796 }
 0x172   : > { %1810 = vrot.lane.b32.xlu0 %v3668_v26, %s3228_s28 }
 0x174   : > { %2987 = vxpose.xlu1.b32.cont [5/16] (narrow) %v4358_v63, 32 }
 0x175   : > { %v3937_v19 = vpop.permute.xlu1 %1794 }
 0x176   : > { %1778 = vrot.lane.b32.xlu0 %v3494_v52, %s3228_s28 }
 0x178   : > { %2989 = vxpose.xlu1.b32.cont [6/16] (narrow) %v3707_v27, 32 }
 0x179   : > { %v3942_v12 = vpop.permute.xlu1 %1800 }
 0x17c   : > { %v2900_v44 = vpop.permute.xlu0 %2899  ;;  %2991 = vxpose.xlu1.b32.cont [7/16] (narrow) %v3740_v25, 32 }
 0x17d   : > { %v3945_v49 = vpop.permute.xlu1 %1798 }
 0x180   : > { %v2905_v55 = vpop.permute.xlu0 %2904  ;;  %2993 = vxpose.xlu1.b32.cont [8/16] (narrow) %v3729_v4, 32 }
 0x181   : > { %v3948_v26 = vpop.permute.xlu1 %1804 }
 0x184   : > { %v3950_v3 = vpop.permute.xlu0 %1816  ;;  %2995 = vxpose.xlu1.b32.cont [9/16] (narrow) %v3762_v5, 32 }
 0x185   : > { %v3953_v6 = vpop.permute.xlu1 %1802 }
 0x188   : > { %v3955_v52 = vpop.permute.xlu0 %1820  ;;  %2997 = vxpose.xlu1.b32.cont [10/16] (narrow) %v3751_v45, 32 }
 0x189   : > { %v3958_v14 = vpop.permute.xlu1 %1808 }
 0x18c   : > { %v2925_v27 = vpop.permute.xlu0 %2924  ;;  %2999 = vxpose.xlu1.b32.cont [11/16] (narrow) %v3784_v2, 32  ;;  %v1973_v2 = vld [vmem:[#allocation4] sm:$0x1] }
 0x18d   : > { %v3961_v35 = vpop.permute.xlu1 %1806 }
 0x190   : > { %v3963_v4 = vpop.permute.xlu0 %1818  ;;  %3001 = vxpose.xlu1.b32.cont [12/16] (narrow) %v3773_v34, 32 }
 0x191   : > { %v2910_v13 = vpop.permute.xlu1 %2909 }
 0x194   : > { %v3966_v25 = vpop.permute.xlu0 %1824  ;;  %3031 = vxpose.xlu0.b32.start [1/16] (narrow) %v2905_v55, 32  ;;  %3003 = vxpose.xlu1.b32.cont [13/16] (narrow) %v3806_v46, 32  ;;  %v1974_v46 = vmax.f32 %v1973_v2, 1e-24  ;;  %v917_v2 = vld [vmem:[%s4348_s3 + $0x20] sm:$0xff] }
 0x195   : > { %v2915_v61 = vpop.permute.xlu1 %2914 }
 0x196   : > { %3082 = vrsqrt.f32 %v1974_v46  ;;  %v914_v46 = vld [vmem:[%s4348_s3 + $0x8] sm:$0xff] }
 0x197   : > { %3084 = vrsqrt.f32 %v1971_v22 }
 0x198   : > { %v2935_v5 = vpop.permute.xlu0 %2934  ;;  %3033 = vxpose.xlu0.b32.cont [2/16] (narrow) %v2900_v44, 32  ;;  %3005 = vxpose.xlu1.b32.cont [14/16] (narrow) %v3795_v0, 32 }
 0x199   : > { %v2920_v58 = vpop.permute.xlu1 %2919 }
 0x19c   : > { %v3970_v45 = vpop.permute.xlu0 %1822  ;;  %3035 = vxpose.xlu0.b32.cont [3/16] (narrow) %v2915_v61, 32  ;;  %3007 = vxpose.xlu1.b32.cont [15/16] (narrow) %v2973_v7, 32 }
 0x19d   : > { %v2930_v56 = vpop.permute.xlu1 %2929 }
 0x1a0   : > { %v3972_v50 = vpop.permute.xlu0 %1828  ;;  %3037 = vxpose.xlu0.b32.cont [4/16] (narrow) %v2910_v13, 32  ;;  %3009 = vxpose.xlu1.b32.end [16/16] (narrow) %v3817_v18, 32 }
 0x1a1   : > { %v2940_v0 = vpop.permute.xlu1 %2939 }
 0x1a3   : > { %v3083_v42 = vpop.eup %3082 }
 0x1a4   : > { %v2945_v34 = vpop.permute.xlu0 %2944  ;;  %3039 = vxpose.xlu0.b32.cont [5/16] (narrow) %v2925_v27, 32  ;;  %v1982_v21 = vrot.slane %v3083_v42, %v1981_v41  ;;  %v3085_v55 = vpop.eup %3084  ;;  %v3126_v42 = vld [vmem:[%s3374_s16 + $0x48] sm:$0xff] }
 0x1a5   : > { %v2950_v18 = vpop.permute.xlu1 %2949 }
 0x1a8   : > { %v3975_v36 = vpop.permute.xlu0 %1826  ;;  %3041 = vxpose.xlu0.b32.cont [6/16] (narrow) %v2920_v58, 32  ;;  %v920_v58 = vld [vmem:[%s4348_s3 + $0x38] sm:$0xff] }
 0x1a9   : > { %v2960_v53 = vpop.permute.xlu1 %2959  ;;  %2775 = vmatprep.subr.mxu0 %v920_v58 }
 0x1aa   : > { %2776 = vmatpush3.msra.mxu0 %v920_v58  ;;  %v3145_v58 = vld [vmem:[%s3374_s16 + $0xe0] sm:$0xff] }
 0x1ac   : > { %v1833_v37 = vpop.permute.xlu0 %1832  ;;  %3043 = vxpose.xlu0.b32.cont [7/16] (narrow) %v2935_v5, 32  ;;  %v4359_v5 = vmov 0.0  }
 0x1ad   : > { %v2970_v9 = vpop.permute.xlu1 %2969  ;;  %307 = vst.msk [vmem:[#allocation2] sm:$0xff] %vm306_vm2, %v4359_v5  ;;  %308 = vst.msk [vmem:[#allocation2 + $0x8] sm:$0xff] %vm306_vm2, %v4359_v5 }
 0x1ae   : > { %309 = vst.msk [vmem:[#allocation2 + $0x10] sm:$0xff] %vm306_vm2, %v4359_v5  ;;  %310 = vst.msk [vmem:[#allocation2 + $0x18] sm:$0xff] %vm306_vm2, %v4359_v5 }
 0x1af   : > { %311 = vst.msk [vmem:[#allocation2 + $0x20] sm:$0xff] %vm306_vm2, %v4359_v5  ;;  %312 = vst.msk [vmem:[#allocation2 + $0x28] sm:$0xff] %vm306_vm2, %v4359_v5 }
 0x1b0   : > { %v2955_v28 = vpop.permute.xlu0 %2954  ;;  %3045 = vxpose.xlu0.b32.cont [8/16] (narrow) %v2930_v56, 32  ;;  %313 = vst.msk [vmem:[#allocation2 + $0x30] sm:$0xff] %vm306_vm2, %v4359_v5  ;;  %314 = vst.msk [vmem:[#allocation2 + $0x38] sm:$0xff] %vm306_vm2, %v4359_v5  ;;  %v916_v56 = vld [vmem:[%s4348_s3 + $0x18] sm:$0xff] }
 0x1b4   : > { %v1831_v32 = vpop.permute.xlu0 %1830  ;;  %3047 = vxpose.xlu0.b32.cont [9/16] (narrow) %v2945_v34, 32  ;;  %v918_v34 = vld [vmem:[%s4348_s3 + $0x28] sm:$0xff] }
 0x1b8   : > { %v1837_v48 = vpop.permute.xlu0 %1836  ;;  %3049 = vxpose.xlu0.b32.cont [10/16] (narrow) %v2940_v0, 32  ;;  %v3118_v0 = vld [vmem:[%s3374_s16 + $0x8] sm:$0xff] }
 0x1bc   : > { %v2965_v51 = vpop.permute.xlu0 %2964  ;;  %3051 = vxpose.xlu0.b32.cont [11/16] (narrow) %v2955_v28, 32  ;;  %v3119_v28 = vld [vmem:[%s3374_s16 + $0x10] sm:$0xff] }
 0x1be   : > { %2082 = vrot.lane.b32.xlu1 %v1982_v21, %s3228_s28 }
 0x1c0   : > { %v1835_v16 = vpop.permute.xlu0 %1834  ;;  %3053 = vxpose.xlu0.b32.cont [12/16] (narrow) %v2950_v18, 32  ;;  %v3123_v18 = vld [vmem:[%s3374_s16 + $0x30] sm:$0xff] }
 0x1c4   : > { %v1841_v59 = vpop.permute.xlu0 %1840  ;;  %3055 = vxpose.xlu0.b32.cont [13/16] (narrow) %v2965_v51, 32  ;;  %v3127_v51 = vld [vmem:[%s3374_s16 + $0x50] sm:$0xff] }
 0x1c5   : > { %2603 = vmatprep.subr.mxu1 %v1841_v59  ;;  %v3131_v59 = vld [vmem:[%s3374_s16 + $0x70] sm:$0xff] }
 0x1c8   : > { %v2975_v17 = vpop.permute.xlu0 %2974  ;;  %3057 = vxpose.xlu0.b32.cont [14/16] (narrow) %v2960_v53, 32  ;;  %v3129_v53 = vld [vmem:[%s3374_s16 + $0x60] sm:$0xff] }
 0x1cc   : > { %3059 = vxpose.xlu0.b32.cont [15/16] (narrow) %v2975_v17, 32  ;;  %v1839_v33 = vpop.permute.xlu0 %1838  ;;  %v3133_v17 = vld [vmem:[%s3374_s16 + $0x80] sm:$0xff] }
 0x1d0   : > { %3061 = vxpose.xlu0.b32.end [16/16] (narrow) %v2970_v9, 32  ;;  %v1785_v1 = vpop.permute.xlu0 %1784  ;;  %v3132_v9 = vld [vmem:[%s3374_s16 + $0x78] sm:$0xff] }
 0x1d4   : > { %v1815_v29 = vpop.permute.xlu0 %1814 }
 0x1d8   : > { %v1783_v23 = vpop.permute.xlu0 %1782 }
 0x1e0   : > { %v3010_v30 = vpop.trf.xlu1 }
 0x1e1   : > { %v3014_v62 = vunpack.i.h.bf16 %v3010_v30  ;;  %v3011_v40 = vunpack.i.l.bf16 %v3010_v30  ;;  %v1387_v30 = vld [vmem:[#allocation2] sm:$0xff] }
 0x1e3   : > { %1519 = vmatprep.mubr.f32.mxu1 %v3011_v40 }
 0x1e4   : > { %v3015_v10 = vpop.trf.xlu1  ;;  %1520 = vmatmul.mubr.f32.vlgmr.msra.gmra.mxu1 %v3014_v62  ;;  %v3136_v62 = vld [vmem:[%s3374_s16 + $0x98] sm:$0xff] }
 0x1e5   : > { %2604 = vmatpush3.msra.mxu1 %v3958_v14  ;;  %v3016_v39 = vunpack.i.l.bf16 %v3015_v10  ;;  %v3019_v8 = vunpack.i.h.bf16 %v3015_v10  ;;  %v3137_v10 = vld [vmem:[%s3374_s16 + $0xa0] sm:$0xff] }
 0x1e6   : > { %2605 = vmatprep.subr.mxu1 %v1839_v33  ;;  %v3134_v33 = vld [vmem:[%s3374_s16 + $0x88] sm:$0xff] }
 0x1e7   : > { %2606 = vmatpush3.msra.mxu1 %v3961_v35  ;;  %1984 = vxpose.xlu1.b32.start [1/4] (short) (narrow) %v1982_v21, 32 }
 0x1e8   : > { %1524 = vmatprep.mubr.f32.mxu1 %v3016_v39  ;;  %2607 = vmatprep.subr.mxu1 %v1837_v48  ;;  %v3020_v43 = vpop.trf.xlu1  ;;  %v3124_v48 = vld [vmem:[%s3374_s16 + $0x38] sm:$0xff] }
 0x1e9   : > { %1525 = vmatmul.mubr.f32.gmra.mxu1 %v3019_v8  ;;  %v3021_v47 = vunpack.i.l.bf16 %v3020_v43  ;;  %v3024_v54 = vunpack.i.h.bf16 %v3020_v43  ;;  %v3138_v8 = vld [vmem:[%s3374_s16 + $0xa8] sm:$0xff] }
 0x1ea   : > { %2608 = vmatpush3.msra.mxu1 %v3948_v26  ;;  %v1813_v26 = vpop.permute.xlu0 %1812  ;;  %v1388_v43 = vld [vmem:[#allocation2 + $0x8] sm:$0xff] }
 0x1eb   : > { %2609 = vmatprep.subr.mxu1 %v1835_v16  ;;  %1985 = vxpose.xlu1.b32.cont [2/4] (short) (narrow) %v1982_v21, 32  ;;  %v3130_v16 = vld [vmem:[%s3374_s16 + $0x68] sm:$0xff] }
 0x1ec   : > { %2610 = vmatpush3.msra.mxu1 %v3953_v6  ;;  %1529 = vmatprep.mubr.f32.mxu1 %v3021_v47  ;;  %v3025_v7 = vpop.trf.xlu1  ;;  %v1976_v6 = vld [vmem:[%s4349_s4] sm:$0x1] }
 0x1ed   : > { %2611 = vmatprep.subr.mxu1 %v1833_v37  ;;  %1530 = vmatmul.mubr.f32.gmra.mxu1 %v3024_v54  ;;  %v3026_v63 = vunpack.i.l.bf16 %v3025_v7  ;;  %v3029_v44 = vunpack.i.h.bf16 %v3025_v7  ;;  %v913_v37 = vld [vmem:[%s4348_s3] sm:$0xff] }
 0x1ee   : > { %2612 = vmatpush3.msra.mxu1 %v3942_v12  ;;  %v1977_v12 = vmul.f32 %v3085_v55, %v1976_v6  ;;  %v3140_v55 = vld [vmem:[%s3374_s16 + $0xb8] sm:$0xff] }
 0x1ef   : > { %2613 = vmatprep.subr.mxu1 %v1831_v32  ;;  %1986 = vxpose.xlu1.b32.cont [3/4] (short) (narrow) %v1982_v21, 32  ;;  %v3121_v32 = vld [vmem:[%s3374_s16 + $0x20] sm:$0xff] }
 0x1f0   : > { %2614 = vmatpush3.msra.mxu1 %v3945_v49  ;;  %1534 = vmatprep.mubr.f32.mxu1 %v3026_v63  ;;  %v1781_v49 = vpop.permute.xlu0 %1780  ;;  %v4002_v14 = vrot.slane %v1977_v12, %v1981_v41  ;;  %v3125_v41 = vld [vmem:[%s3374_s16 + $0x40] sm:$0xff] }
 0x1f1   : > { %2615 = vmatprep.subr.mxu1 %v3972_v50  ;;  %1535 = vmatmul.mubr.f32.gmra.mxu1 %v3029_v44  ;;  %v919_v50 = vld [vmem:[%s4348_s3 + $0x30] sm:$0xff]  ;;  %v3141_v12 = vld [vmem:[%s3374_s16 + $0xc0] sm:$0xff] }
 0x1f2   : > { %2616 = vmatpush3.msra.mxu1 %v3932_v38  ;;  %2777 = vmatprep.subr.mxu0 %v919_v50 }
 0x1f3   : > { %2617 = vmatprep.subr.mxu1 %v3975_v36  ;;  %1987 = vxpose.xlu1.b32.end [4/4] (short) (narrow) %v1982_v21, 32  ;;  %v915_v36 = vld [vmem:[%s4348_s3 + $0x10] sm:$0xff]  ;;  %v3128_v21 = vld [vmem:[%s3374_s16 + $0x58] sm:$0xff] }
 0x1f4   : > { %2618 = vmatpush3.msra.mxu1 %v3937_v19  ;;  %2778 = vmatpush3.msra.mxu0 %v919_v50 }
 0x1f5   : > { %2619 = vmatprep.subr.mxu1 %v3966_v25  ;;  %2779 = vmatprep.subr.mxu0 %v918_v34 }
 0x1f6   : > { %2620 = vmatpush3.msra.mxu1 %v3922_v60  ;;  %v1811_v60 = vpop.permute.xlu0 %1810  ;;  %2780 = vmatpush3.msra.mxu0 %v918_v34 }
 0x1f7   : > { %2621 = vmatprep.subr.mxu1 %v3970_v45  ;;  %2781 = vmatprep.subr.mxu0 %v917_v2 }
 0x1f8   : > { %2622 = vmatpush3.msra.mxu1 %v3927_v57  ;;  %2782 = vmatpush3.msra.mxu0 %v917_v2  ;;  %v3146_v2 = vld [vmem:[%s3374_s16 + $0xe8] sm:$0xff] }
 0x1f9   : > { %2623 = vmatprep.subr.mxu1 %v3955_v52  ;;  %2125 = vrot.lane.b32.xlu0 %v4002_v14, %s3228_s28  ;;  %s2438_s28 = sshll.u32 %s3217_s24, 10  ;;  %s4300_s24 = scalar_lea.sflag [#allocation6], %s279_s30 }
 0x1fa   : > { %2624 = vmatpush3.msra.mxu1 %v3912_v15  ;;  %v1779_v57 = vpop.permute.xlu0 %1778  ;;  %2783 = vmatprep.subr.mxu0 %v916_v56  ;;  %s4291_s13 = scalar_lea.hbm %s4351_s6, %s2438_s28 }
 0x1fb   : > { %2625 = vmatprep.subr.mxu1 %v3963_v4  ;;  %2784 = vmatpush3.msra.mxu0 %v916_v56 }
 0x1fc   : > { %2626 = vmatpush3.msra.mxu1 %v3917_v31  ;;  %2785 = vmatprep.subr.mxu0 %v915_v36 }
 0x1fd   : > { %2627 = vmatprep.subr.mxu1 %v3950_v3  ;;  %2786 = vmatpush3.msra.mxu0 %v915_v36  ;;  %v3147_v36 = vld [vmem:[%s3374_s16 + $0xf0] sm:$0xff] }
 0x1fe   : > { %2628 = vmatpush3.msra.mxu1 %v1785_v1  ;;  %2787 = vmatprep.subr.mxu0 %v914_v46 }
 0x1ff   : > { %2629 = vmatprep.subr.mxu1 %v1815_v29  ;;  %2788 = vmatpush3.msra.mxu0 %v914_v46 }
 0x200   : > { %2630 = vmatpush3.msra.mxu1 %v1783_v23  ;;  %2789 = vmatprep.subr.mxu0 %v913_v37  ;;  %v3139_v23 = vld [vmem:[%s3374_s16 + $0xb0] sm:$0xff] }
 0x201   : > { %2631 = vmatprep.subr.mxu1 %v1813_v26  ;;  %2790 = vmatpush3.msra.mxu0 %v913_v37  ;;  %v1389_v26 = vld [vmem:[#allocation2 + $0x10] sm:$0xff] }
 0x202   : > { %2632 = vmatpush3.msra.mxu1 %v1781_v49  ;;  %2792 = vmatmul.mubr.msk.f32.vlgmr.msra.gmra.mxu0 %vm358_vm0, %v3118_v0 }
 0x203   : > { %2633 = vmatprep.subr.mxu1 %v1811_v60  ;;  %2794 = vmatprep.mubr.msk.f32.mxu0 %vm358_vm0, %v3119_v28 }
 0x204   : > { %2634 = vmatpush3.msra.mxu1 %v1779_v57 }
 0x206   : > { %2795 = vmatmul.mubr.msk.f32.gmra.mxu0 %vm358_vm0, %v3120_v11  ;;  %v3148_v11 = vld [vmem:[%s3374_s16 + $0xf8] sm:$0xff] }
 0x207   : > { %2797 = vmatprep.mubr.msk.f32.mxu0 %vm358_vm0, %v3121_v32 }
 0x20a   : > { %2798 = vmatmul.mubr.msk.f32.gmra.mxu0 %vm358_vm0, %v3122_v24 }
 0x20b   : > { %2800 = vmatprep.mubr.msk.f32.mxu0 %vm358_vm0, %v3123_v18 }
 0x20e   : > { %2801 = vmatmul.mubr.msk.f32.gmra.mxu0 %vm358_vm0, %v3124_v48 }
 0x20f   : > { %2803 = vmatprep.mubr.msk.f32.mxu0 %vm358_vm0, %v3125_v41 }
 0x210   : > { %v3062_v38 = vpop.trf.xlu0 }
 0x211   : > { %v3066_v15 = vunpack.i.h.bf16 %v3062_v38  ;;  %v3063_v19 = vunpack.i.l.bf16 %v3062_v38 }
 0x212   : > { %2804 = vmatmul.mubr.msk.f32.gmra.mxu0 %vm358_vm0, %v3126_v42 }
 0x213   : > { %1938 = vmatprep.mubr.f32.mxu1 %v3063_v19  ;;  %2806 = vmatprep.mubr.msk.f32.mxu0 %vm358_vm0, %v3127_v51  ;;  %v3142_v19 = vld [vmem:[%s3374_s16 + $0xc8] sm:$0xff] }
 0x214   : > { %v3067_v52 = vpop.trf.xlu0  ;;  %1939 = vmatmul.mubr.f32.vlgmr.msra.gmra.mxu1 %v3066_v15 }
 0x215   : > { %v3068_v27 = vunpack.i.l.bf16 %v3067_v52  ;;  %v3071_v35 = vunpack.i.h.bf16 %v3067_v52 }
 0x216   : > { %2807 = vmatmul.mubr.msk.f32.gmra.mxu0 %vm358_vm0, %v3128_v21  ;;  %v1550_v21 = vld [vmem:[#allocation2 + $0x20] sm:$0xff] }
 0x217   : > { %1943 = vmatprep.mubr.f32.mxu1 %v3068_v27  ;;  %2809 = vmatprep.mubr.msk.f32.mxu0 %vm358_vm0, %v3129_v53  ;;  %v1390_v27 = vld [vmem:[#allocation2 + $0x18] sm:$0xff] }
 0x218   : > { %v3072_v31 = vpop.trf.xlu0  ;;  %1944 = vmatmul.mubr.f32.gmra.mxu1 %v3071_v35 }
 0x219   : > { %v3073_v3 = vunpack.i.l.bf16 %v3072_v31  ;;  %v3076_v4 = vunpack.i.h.bf16 %v3072_v31  ;;  %v3143_v31 = vld [vmem:[%s3374_s16 + $0xd0] sm:$0xff] }
 0x21a   : > { %2810 = vmatmul.mubr.msk.f32.gmra.mxu0 %vm358_vm0, %v3130_v16 }
 0x21b   : > { %1948 = vmatprep.mubr.f32.mxu1 %v3073_v3  ;;  %2812 = vmatprep.mubr.msk.f32.mxu0 %vm358_vm0, %v3131_v59 }
 0x21c   : > { %v3077_v13 = vpop.trf.xlu0  ;;  %1949 = vmatmul.mubr.f32.gmra.mxu1 %v3076_v4 }
 0x21d   : > { %v3078_v25 = vunpack.i.l.bf16 %v3077_v13  ;;  %v3081_v61 = vunpack.i.h.bf16 %v3077_v13 }
 0x21e   : > { %2813 = vmatmul.mubr.msk.f32.gmra.mxu0 %vm358_vm0, %v3132_v9 }
 0x21f   : > { %1953 = vmatprep.mubr.f32.mxu1 %v3078_v25  ;;  %2815 = vmatprep.mubr.msk.f32.mxu0 %vm358_vm0, %v3133_v17  ;;  %v3144_v25 = vld [vmem:[%s3374_s16 + $0xd8] sm:$0xff]  ;;  %v1551_v17 = vld [vmem:[#allocation2 + $0x28] sm:$0xff]  ;;  %s3155_s16 = scalar_lea.vmem %s3154_s17, 2048 }
 0x220   : > { %1954 = vmatmul.mubr.f32.gmra.mxu1 %v3081_v61  ;;  %p3157_p2 = scmp.lt.s32.totalorder %s3155_s16, %s3149_s14 }
 0x222   : > { %2816 = vmatmul.mubr.msk.f32.gmra.mxu0 %vm358_vm0, %v3134_v33  ;;  %p3158_p3 = por %p3157_p2, %p3156_p1 }
 0x223   : > { %2818 = vmatprep.mubr.msk.f32.mxu0 %vm358_vm0, %v3135_v20 }
 0x224   : > { %p3159_p5 = pnand %p3158_p3, %p3152_p0 }
 0x226   : > { %2819 = vmatmul.mubr.msk.f32.gmra.mxu0 %vm358_vm0, %v3136_v62 }
 0x227   : > { %2821 = vmatprep.mubr.msk.f32.mxu0 %vm358_vm0, %v3137_v10 }
 0x22a   : > { %2822 = vmatmul.mubr.msk.f32.gmra.mxu0 %vm358_vm0, %v3138_v8  ;;  %v1553_v8 = vld [vmem:[#allocation2 + $0x38] sm:$0xff] }
 0x22b   : > { %2824 = vmatprep.mubr.msk.f32.mxu0 %vm358_vm0, %v3139_v23 }
 0x22e   : > { %2825 = vmatmul.mubr.msk.f32.gmra.mxu0 %vm358_vm0, %v3140_v55 }
 0x22f   : > { %2827 = vmatprep.mubr.msk.f32.mxu0 %vm358_vm0, %v3141_v12 }
 0x230   : > { %v2083_v45 = vpop.permute.xlu1 %2082 }
 0x231   : > { %2085 = vxpose.xlu0.b32.start [1/4] (short) (narrow) %v2083_v45, 32 }
 0x232   : > { %2828 = vmatmul.mubr.msk.f32.gmra.mxu0 %vm358_vm0, %v3142_v19 }
 0x233   : > { %2830 = vmatprep.mubr.msk.f32.mxu0 %vm358_vm0, %v3143_v31 }
 0x235   : > { %2086 = vxpose.xlu0.b32.cont [2/4] (short) (narrow) %v2083_v45, 32 }
 0x236   : > { %2831 = vmatmul.mubr.msk.f32.gmra.mxu0 %vm358_vm0, %v3144_v25 }
 0x237   : > { %2833 = vmatprep.mubr.msk.f32.mxu0 %vm358_vm0, %v3145_v58 }
 0x239   : > { %2087 = vxpose.xlu0.b32.cont [3/4] (short) (narrow) %v2083_v45, 32 }
 0x23a   : > { %2834 = vmatmul.mubr.msk.f32.gmra.mxu0 %vm358_vm0, %v3146_v2 }
 0x23b   : > { %2836 = vmatprep.mubr.msk.f32.mxu0 %vm358_vm0, %v3147_v36 }
 0x23d   : > { %2088 = vxpose.xlu0.b32.end [4/4] (short) (narrow) %v2083_v45, 32 }
 0x23e   : > { %2837 = vmatmul.mubr.msk.f32.gmra.mxu0 %vm358_vm0, %v3148_v11 }
 0x263   : > { %v2000_v54 = vpop.trf.xlu1 }
 0x267   : > { %v2001_v57 = vpop.trf.xlu1 }
 0x26b   : > { %v2002_v45 = vpop.trf.xlu1  ;;  %v2126_v51 = vpop.permute.xlu0 %2125 }
 0x26f   : > { %v2003_v0 = vpop.trf.xlu1 }
 0x2a4   : > { %v2591_v1 = vpop.f32.mrf.mxu1 }
 0x2a6   : > { %v2592_v22 = vpop.f32.mrf.mxu1 }
 0x2a7   : > { %v2593_v40 = vadd.f32 %v2592_v22, %v2591_v1  ;;  %v1552_v22 = vld [vmem:[#allocation2 + $0x30] sm:$0xff] }
 0x2a9   : > { %v1540_v29 = vadd.f32 %v2593_v40, %v1387_v30  ;;  %v2594_v39 = vpop.f32.mrf.mxu1 }
 0x2ab   : > { %1545 = vst.msk [vmem:[#allocation2] sm:$0xff] %vm306_vm2, %v1540_v29  ;;  %v2595_v47 = vpop.f32.mrf.mxu1 }
 0x2ac   : > { %v2596_v7 = vadd.f32 %v2595_v47, %v2594_v39 }
 0x2ad   : > { %v2597_v63 = vpop.f32.mrf.mxu1  ;;  %v2101_v20 = vpop.trf.xlu0 }
 0x2ae   : > { %v1541_v44 = vadd.f32 %v2596_v7, %v1388_v43 }
 0x2af   : > { %v2598_v6 = vpop.f32.mrf.mxu1 }
 0x2b0   : > { %1546 = vst.msk [vmem:[#allocation2 + $0x8] sm:$0xff] %vm306_vm2, %v1541_v44  ;;  %v2599_v49 = vadd.f32 %v2598_v6, %v2597_v63 }
 0x2b1   : > { %v2600_v60 = vpop.f32.mrf.mxu1  ;;  %v2102_v29 = vpop.trf.xlu0 }
 0x2b2   : > { %v1542_v38 = vadd.f32 %v2599_v49, %v1389_v26  ;;  %v2016_v15 = vld [vmem:[#allocation2] sm:$0xff] }
 0x2b3   : > { %v2020_v52 = vmul.f32 %v2016_v15, %v2000_v54  ;;  %v2601_v35 = vpop.f32.mrf.mxu1 }
 0x2b4   : > { %1547 = vst.msk [vmem:[#allocation2 + $0x10] sm:$0xff] %vm306_vm2, %v1542_v38  ;;  %v2602_v3 = vadd.f32 %v2601_v35, %v2600_v60 }
 0x2b5   : > { %v4107_v4 = vmul.f32 %v4002_v14, %v2020_v52  ;;  %v2103_v55 = vpop.trf.xlu0 }
 0x2b6   : > { %v1543_v13 = vadd.f32 %v2602_v3, %v1390_v27 }
 0x2b7   : > { %v2017_v61 = vld [vmem:[#allocation2 + $0x8] sm:$0xff]  ;;  %v2034_v5 = vsel %vm306_vm2, %v4107_v4, -inf }
 0x2b8   : > { %1548 = vst.msk [vmem:[#allocation2 + $0x18] sm:$0xff] %vm306_vm2, %v1543_v13  ;;  %v2021_v50 = vmul.f32 %v2017_v61, %v2001_v57  ;;  %2035 = vmax.xlane.f32.xlu1 %v2034_v5 }
 0x2b9   : > { %v2104_v38 = vpop.trf.xlu0 }
 0x2ba   : > { %v4117_v34 = vmul.f32 %v4002_v14, %v2021_v50 }
 0x2bb   : > { %v2018_v56 = vld [vmem:[#allocation2 + $0x10] sm:$0xff] }
 0x2bc   : > { %v2022_v46 = vmul.f32 %v2018_v56, %v2002_v45  ;;  %v2037_v37 = vsel %vm306_vm2, %v4117_v34, -inf }
 0x2bd   : > { %2038 = vmax.xlane.f32.xlu0 %v2037_v37 }
 0x2be   : > { %v4126_v28 = vmul.f32 %v4002_v14, %v2022_v46 }
 0x2bf   : > { %v2019_v32 = vld [vmem:[#allocation2 + $0x18] sm:$0xff] }
 0x2c0   : > { %v2023_v24 = vmul.f32 %v2019_v32, %v2003_v0  ;;  %v2040_v18 = vsel %vm306_vm2, %v4126_v28, -inf }
 0x2c1   : > { %2041 = vmax.xlane.f32.xlu1 %v2040_v18 }
 0x2c2   : > { %v4133_v48 = vmul.f32 %v4002_v14, %v2023_v24  ;;  %v2793_v18 = vpop.f32.mrf.mxu0 }
 0x2c3   : > { %1147 = vst.msk [vmem:[%s4176_s20 + $0x8] sm:$0xff] %vm358_vm0, %v2793_v18 }
 0x2c4   : > { %v2043_v41 = vsel %vm306_vm2, %v4133_v48, -inf }
 0x2c5   : > { %2044 = vmax.xlane.f32.xlu1 %v2043_v41 }
 0x2d4   : > { %v2635_v42 = vpop.f32.mrf.mxu1 }
 0x2d6   : > { %v2636_v53 = vpop.f32.mrf.mxu1 }
 0x2d7   : > { %v2637_v16 = vadd.f32 %v2636_v53, %v2635_v42 }
 0x2d8   : > { %v2638_v59 = vpop.f32.mrf.mxu1 }
 0x2d9   : > { %v1959_v9 = vadd.f32 %v2637_v16, %v1550_v21 }
 0x2da   : > { %v2639_v33 = vpop.f32.mrf.mxu1 }
 0x2db   : > { %1963 = vst.msk [vmem:[#allocation2 + $0x20] sm:$0xff] %vm306_vm2, %v1959_v9  ;;  %v2640_v1 = vadd.f32 %v2639_v33, %v2638_v59 }
 0x2dc   : > { %v2641_v30 = vpop.f32.mrf.mxu1 }
 0x2dd   : > { %v1960_v14 = vadd.f32 %v2640_v1, %v1551_v17 }
 0x2de   : > { %v2642_v62 = vpop.f32.mrf.mxu1 }
 0x2df   : > { %1964 = vst.msk [vmem:[#allocation2 + $0x28] sm:$0xff] %vm306_vm2, %v1960_v14  ;;  %v2643_v40 = vadd.f32 %v2642_v62, %v2641_v30 }
 0x2e0   : > { %v2644_v10 = vpop.f32.mrf.mxu1 }
 0x2e1   : > { %v1961_v39 = vadd.f32 %v2643_v40, %v1552_v22 }
 0x2e2   : > { %v2645_v43 = vpop.f32.mrf.mxu1  ;;  %v2117_v47 = vld [vmem:[#allocation2 + $0x20] sm:$0xff] }
 0x2e3   : > { %1965 = vst.msk [vmem:[#allocation2 + $0x30] sm:$0xff] %vm306_vm2, %v1961_v39  ;;  %v2646_v54 = vadd.f32 %v2645_v43, %v2644_v10  ;;  %v2121_v23 = vmul.f32 %v2117_v47, %v2101_v20 }
 0x2e5   : > { %v1962_v7 = vadd.f32 %v2646_v54, %v1553_v8  ;;  %v2128_v63 = vmul.f32 %v2126_v51, %v2121_v23 }
 0x2e6   : > { %v2118_v44 = vld [vmem:[#allocation2 + $0x28] sm:$0xff] }
 0x2e7   : > { %1966 = vst.msk [vmem:[#allocation2 + $0x38] sm:$0xff] %vm306_vm2, %v1962_v7  ;;  %v2122_v26 = vmul.f32 %v2118_v44, %v2102_v29  ;;  %v2132_v6 = vsel %vm306_vm2, %v2128_v63, -inf }
 0x2e8   : > { %2133 = vmax.xlane.f32.xlu1 %v2132_v6 }
 0x2e9   : > { %v2129_v12 = vmul.f32 %v2126_v51, %v2122_v26 }
 0x2ea   : > { %v2119_v49 = vld [vmem:[#allocation2 + $0x30] sm:$0xff] }
 0x2eb   : > { %v2123_v60 = vmul.f32 %v2119_v49, %v2103_v55  ;;  %v2135_v57 = vsel %vm306_vm2, %v2129_v12, -inf }
 0x2ec   : > { %2136 = vmax.xlane.f32.xlu1 %v2135_v57 }
 0x2ed   : > { %v4143_v15 = vmul.f32 %v2126_v51, %v2123_v60 }
 0x2ee   : > { %v2120_v19 = vld [vmem:[#allocation2 + $0x38] sm:$0xff] }
 0x2ef   : > { %v2124_v52 = vmul.f32 %v2120_v19, %v2104_v38  ;;  %v2138_v27 = vsel %vm306_vm2, %v4143_v15, -inf }
 0x2f0   : > { %2139 = vmax.xlane.f32.xlu1 %v2138_v27 }
 0x2f1   : > { %v4147_v35 = vmul.f32 %v2126_v51, %v2124_v52 }
 0x2f3   : > { %v2141_v31 = vsel %vm306_vm2, %v4147_v35, -inf }
 0x2f4   : > { %2142 = vmax.xlane.f32.xlu1 %v2141_v31 }
 0x341   : > { %v2036_v3 = vpop.xlane.xlu1 %2035 }
 0x342   : > { %v2046_v13 = vsub.f32 %v4107_v4, %v2036_v3 }
 0x344   : > { %v2050_v25 = vmul.f32 1.442695, %v2046_v13 }
 0x346   : > { %3086 = vpow2.f32 %v2050_v25  ;;  %v2039_v61 = vpop.xlane.xlu0 %2038 }
 0x347   : > { %v2047_v5 = vsub.f32 %v4117_v34, %v2039_v61 }
 0x349   : > { %v2052_v45 = vmul.f32 1.442695, %v2047_v5 }
 0x34a   : > { %v2042_v58 = vpop.xlane.xlu1 %2041 }
 0x34b   : > { %3088 = vpow2.f32 %v2052_v45  ;;  %v2048_v50 = vsub.f32 %v4126_v28, %v2042_v58 }
 0x34d   : > { %v2054_v2 = vmul.f32 1.442695, %v2048_v50 }
 0x34e   : > { %v2045_v56 = vpop.xlane.xlu1 %2044 }
 0x34f   : > { %3090 = vpow2.f32 %v2054_v2  ;;  %v2049_v36 = vsub.f32 %v4133_v48, %v2045_v56  ;;  %v987_v48 = vpop.f32.mrf.mxu0 }
 0x350   : > { %1146 = vst.msk [vmem:[%s4176_s20] sm:$0xff] %vm358_vm0, %v987_v48 }
 0x351   : > { %v2056_v46 = vmul.f32 1.442695, %v2049_v36  ;;  %v2796_v41 = vpop.f32.mrf.mxu0 }
 0x352   : > { %1149 = vst.msk [vmem:[%s4176_s20 + $0x18] sm:$0xff] %vm358_vm0, %v2796_v41 }
 0x353   : > { %v4155_v37 = vpop.eup %3086  ;;  %3092 = vpow2.f32 %v2056_v46  ;;  %v997_v21 = vpop.f32.mrf.mxu0 }
 0x354   : > { %v2058_v4 = vsel %vm306_vm2, %v4155_v37, 0.0  ;;  %1148 = vst.msk [vmem:[%s4176_s20 + $0x10] sm:$0xff] %vm358_vm0, %v997_v21 }
 0x355   : > { %2059 = vadd.xlane.f32.xlu1 %v2058_v4  ;;  %v2799_v16 = vpop.f32.mrf.mxu0 }
 0x356   : > { %1151 = vst.msk [vmem:[%s4176_s20 + $0x28] sm:$0xff] %vm358_vm0, %v2799_v16 }
 0x357   : > { %v1007_v17 = vpop.f32.mrf.mxu0 }
 0x358   : > { %v4159_v34 = vpop.eup %3088  ;;  %1150 = vst.msk [vmem:[%s4176_s20 + $0x20] sm:$0xff] %vm358_vm0, %v1007_v17 }
 0x359   : > { %v2061_v0 = vsel %vm306_vm2, %v4159_v34, 0.0  ;;  %v2802_v20 = vpop.f32.mrf.mxu0 }
 0x35a   : > { %2062 = vadd.xlane.f32.xlu0 %v2061_v0  ;;  %1153 = vst.msk [vmem:[%s4176_s20 + $0x38] sm:$0xff] %vm358_vm0, %v2802_v20 }
 0x35b   : > { %v1017_v14 = vpop.f32.mrf.mxu0 }
 0x35c   : > { %v4163_v28 = vpop.eup %3090  ;;  %1152 = vst.msk [vmem:[%s4176_s20 + $0x30] sm:$0xff] %vm358_vm0, %v1017_v14 }
 0x35d   : > { %v2064_v11 = vsel %vm306_vm2, %v4163_v28, 0.0  ;;  %v2805_v62 = vpop.f32.mrf.mxu0 }
 0x35e   : > { %2065 = vadd.xlane.f32.xlu1 %v2064_v11  ;;  %1155 = vst.msk [vmem:[%s4176_s20 + $0x48] sm:$0xff] %vm358_vm0, %v2805_v62 }
 0x35f   : > { %v1027_v29 = vpop.f32.mrf.mxu0 }
 0x360   : > { %v4167_v32 = vpop.eup %3092  ;;  %1154 = vst.msk [vmem:[%s4176_s20 + $0x40] sm:$0xff] %vm358_vm0, %v1027_v29 }
 0x361   : > { %v2067_v24 = vsel %vm306_vm2, %v4167_v32, 0.0  ;;  %v2808_v8 = vpop.f32.mrf.mxu0 }
 0x362   : > { %2068 = vadd.xlane.f32.xlu0 %v2067_v24  ;;  %1157 = vst.msk [vmem:[%s4176_s20 + $0x58] sm:$0xff] %vm358_vm0, %v2808_v8 }
 0x363   : > { %v1037_v43 = vpop.f32.mrf.mxu0 }
 0x364   : > { %1156 = vst.msk [vmem:[%s4176_s20 + $0x50] sm:$0xff] %vm358_vm0, %v1037_v43 }
 0x365   : > { %v2811_v23 = vpop.f32.mrf.mxu0 }
 0x366   : > { %1159 = vst.msk [vmem:[%s4176_s20 + $0x68] sm:$0xff] %vm358_vm0, %v2811_v23 }
 0x367   : > { %v1047_v7 = vpop.f32.mrf.mxu0 }
 0x368   : > { %1158 = vst.msk [vmem:[%s4176_s20 + $0x60] sm:$0xff] %vm358_vm0, %v1047_v7 }
 0x369   : > { %v2814_v55 = vpop.f32.mrf.mxu0 }
 0x36a   : > { %1161 = vst.msk [vmem:[%s4176_s20 + $0x78] sm:$0xff] %vm358_vm0, %v2814_v55 }
 0x36b   : > { %v1057_v26 = vpop.f32.mrf.mxu0 }
 0x36c   : > { %1160 = vst.msk [vmem:[%s4176_s20 + $0x70] sm:$0xff] %vm358_vm0, %v1057_v26 }
 0x36d   : > { %v2817_v49 = vpop.f32.mrf.mxu0 }
 0x36e   : > { %1163 = vst.msk [vmem:[%s4176_s20 + $0x88] sm:$0xff] %vm358_vm0, %v2817_v49 }
 0x36f   : > { %v1067_v60 = vpop.f32.mrf.mxu0 }
 0x370   : > { %1162 = vst.msk [vmem:[%s4176_s20 + $0x80] sm:$0xff] %vm358_vm0, %v1067_v60 }
 0x371   : > { %v2134_v42 = vpop.xlane.xlu1 %2133 }
 0x372   : > { %v2144_v51 = vsub.f32 %v2128_v63, %v2134_v42 }
 0x374   : > { %v2148_v53 = vmul.f32 1.442695, %v2144_v51 }
 0x375   : > { %v2137_v59 = vpop.xlane.xlu1 %2136 }
 0x376   : > { %3094 = vpow2.f32 %v2148_v53  ;;  %v2145_v9 = vsub.f32 %v2129_v12, %v2137_v59 }
 0x378   : > { %v2150_v33 = vmul.f32 1.442695, %v2145_v9 }
 0x379   : > { %v2140_v1 = vpop.xlane.xlu1 %2139 }
 0x37a   : > { %3096 = vpow2.f32 %v2150_v33  ;;  %v2146_v30 = vsub.f32 %v4143_v15, %v2140_v1  ;;  %v2820_v15 = vpop.f32.mrf.mxu0 }
 0x37b   : > { %1165 = vst.msk [vmem:[%s4176_s20 + $0x98] sm:$0xff] %vm358_vm0, %v2820_v15 }
 0x37c   : > { %v2152_v22 = vmul.f32 1.442695, %v2146_v30  ;;  %v1077_v19 = vpop.f32.mrf.mxu0 }
 0x37d   : > { %v2143_v40 = vpop.xlane.xlu1 %2142  ;;  %1164 = vst.msk [vmem:[%s4176_s20 + $0x90] sm:$0xff] %vm358_vm0, %v1077_v19 }
 0x37e   : > { %3098 = vpow2.f32 %v2152_v22  ;;  %v2147_v10 = vsub.f32 %v4147_v35, %v2143_v40  ;;  %v2823_v52 = vpop.f32.mrf.mxu0 }
 0x37f   : > { %1167 = vst.msk [vmem:[%s4176_s20 + $0xa8] sm:$0xff] %vm358_vm0, %v2823_v52 }
 0x380   : > { %v2154_v39 = vmul.f32 1.442695, %v2147_v10  ;;  %v1087_v27 = vpop.f32.mrf.mxu0 }
 0x381   : > { %1166 = vst.msk [vmem:[%s4176_s20 + $0xa0] sm:$0xff] %vm358_vm0, %v1087_v27 }
 0x382   : > { %3100 = vpow2.f32 %v2154_v39  ;;  %v2826_v35 = vpop.f32.mrf.mxu0 }
 0x383   : > { %v4202_v47 = vpop.eup %3094  ;;  %1169 = vst.msk [vmem:[%s4176_s20 + $0xb8] sm:$0xff] %vm358_vm0, %v2826_v35 }
 0x384   : > { %v2156_v54 = vsel %vm306_vm2, %v4202_v47, 0.0  ;;  %v1097_v31 = vpop.f32.mrf.mxu0 }
 0x385   : > { %2157 = vadd.xlane.f32.xlu1 %v2156_v54  ;;  %1168 = vst.msk [vmem:[%s4176_s20 + $0xb0] sm:$0xff] %vm358_vm0, %v1097_v31 }
 0x386   : > { %v2829_v3 = vpop.f32.mrf.mxu0 }
 0x387   : > { %v4210_v63 = vpop.eup %3096  ;;  %1171 = vst.msk [vmem:[%s4176_s20 + $0xc8] sm:$0xff] %vm358_vm0, %v2829_v3 }
 0x388   : > { %v2159_v44 = vsel %vm306_vm2, %v4210_v63, 0.0  ;;  %v1107_v13 = vpop.f32.mrf.mxu0 }
 0x389   : > { %2160 = vadd.xlane.f32.xlu0 %v2159_v44  ;;  %1170 = vst.msk [vmem:[%s4176_s20 + $0xc0] sm:$0xff] %vm358_vm0, %v1107_v13 }
 0x38a   : > { %v2832_v25 = vpop.f32.mrf.mxu0 }
 0x38b   : > { %v4218_v6 = vpop.eup %3098  ;;  %1173 = vst.msk [vmem:[%s4176_s20 + $0xd8] sm:$0xff] %vm358_vm0, %v2832_v25 }
 0x38c   : > { %v2162_v12 = vsel %vm306_vm2, %v4218_v6, 0.0  ;;  %v1117_v61 = vpop.f32.mrf.mxu0 }
 0x38d   : > { %2163 = vadd.xlane.f32.xlu1 %v2162_v12  ;;  %1172 = vst.msk [vmem:[%s4176_s20 + $0xd0] sm:$0xff] %vm358_vm0, %v1117_v61 }
 0x38e   : > { %v2835_v5 = vpop.f32.mrf.mxu0 }
 0x38f   : > { %v4226_v57 = vpop.eup %3100  ;;  %1175 = vst.msk [vmem:[%s4176_s20 + $0xe8] sm:$0xff] %vm358_vm0, %v2835_v5 }
 0x390   : > { %v2165_v38 = vsel %vm306_vm2, %v4226_v57, 0.0  ;;  %v1127_v45 = vpop.f32.mrf.mxu0 }
 0x391   : > { %2166 = vadd.xlane.f32.xlu0 %v2165_v38  ;;  %1174 = vst.msk [vmem:[%s4176_s20 + $0xe0] sm:$0xff] %vm358_vm0, %v1127_v45 }
 0x392   : > { %v2838_v58 = vpop.f32.mrf.mxu0 }
 0x393   : > { %1177 = vst.msk [vmem:[%s4176_s20 + $0xf8] sm:$0xff] %vm358_vm0, %v2838_v58 }
 0x394   : > { %v1137_v50 = vpop.f32.mrf.mxu0 }
 0x395   : > { %1176 = vst.msk [vmem:[%s4176_s20 + $0xf0] sm:$0xff] %vm358_vm0, %v1137_v50 }
 0x3de   : > { %v2060_v2 = vpop.xlane.xlu1 %2059 }
 0x3df   : > { %3102 = vrcp.f32 %v2060_v2 }
 0x3e3   : > { %v2063_v56 = vpop.xlane.xlu0 %2062 }
 0x3e4   : > { %3104 = vrcp.f32 %v2063_v56 }
 0x3e7   : > { %v2066_v36 = vpop.xlane.xlu1 %2065 }
 0x3e8   : > { %3106 = vrcp.f32 %v2066_v36 }
 0x3eb   : > { %v2069_v46 = vpop.xlane.xlu0 %2068 }
 0x3ec   : > { %v3103_v4 = vpop.eup %3102  ;;  %3108 = vrcp.f32 %v2069_v46 }
 0x3ed   : > { %v2071_v0 = vmul.f32 %v3103_v4, %v4155_v37 }
 0x3ef   : > { %2078 = vst.msk [vmem:[%s4264_s27] sm:$0xff] %vm306_vm2, %v2071_v0 }
 0x3f1   : > { %v3105_v11 = vpop.eup %3104 }
 0x3f2   : > { %v2073_v24 = vmul.f32 %v3105_v11, %v4159_v34 }
 0x3f4   : > { %2079 = vst.msk [vmem:[%s4264_s27 + $0x8] sm:$0xff] %vm306_vm2, %v2073_v24 }
 0x3f5   : > { %v3107_v18 = vpop.eup %3106 }
 0x3f6   : > { %v2075_v48 = vmul.f32 %v3107_v18, %v4163_v28 }
 0x3f8   : > { %2080 = vst.msk [vmem:[%s4264_s27 + $0x10] sm:$0xff] %vm306_vm2, %v2075_v48 }
 0x3f9   : > { %v3109_v37 = vpop.eup %3108 }
 0x3fa   : > { %v2077_v41 = vmul.f32 %v3109_v37, %v4167_v32 }
 0x3fc   : > { %2081 = vst.msk [vmem:[%s4264_s27 + $0x18] sm:$0xff] %vm306_vm2, %v2077_v41 }
 0x40e   : > { %v2158_v42 = vpop.xlane.xlu1 %2157 }
 0x40f   : > { %3110 = vrcp.f32 %v2158_v42 }
 0x412   : > { %v2161_v51 = vpop.xlane.xlu0 %2160 }
 0x413   : > { %3112 = vrcp.f32 %v2161_v51 }
 0x416   : > { %v2164_v34 = vpop.xlane.xlu1 %2163 }
 0x417   : > { %3114 = vrcp.f32 %v2164_v34 }
 0x41a   : > { %v2167_v21 = vpop.xlane.xlu0 %2166 }
 0x41b   : > { %3116 = vrcp.f32 %v2167_v21 }
 0x41c   : > { %v3111_v28 = vpop.eup %3110 }
 0x41d   : > { %v2169_v53 = vmul.f32 %v3111_v28, %v4202_v47 }
 0x41f   : > { %2427 = vst.msk [vmem:[%s4264_s27 + $0x20] sm:$0xff] %vm306_vm2, %v2169_v53 }
 0x420   : > { %v3113_v32 = vpop.eup %3112 }
 0x421   : > { %v2171_v16 = vmul.f32 %v3113_v32, %v4210_v63 }
 0x423   : > { %2428 = vst.msk [vmem:[%s4264_s27 + $0x28] sm:$0xff] %vm306_vm2, %v2171_v16 }
 0x424   : > { %v3115_v59 = vpop.eup %3114 }
 0x425   : > { %v2173_v9 = vmul.f32 %v3115_v59, %v4218_v6 }
 0x427   : > { %2429 = vst.msk [vmem:[%s4264_s27 + $0x30] sm:$0xff] %vm306_vm2, %v2173_v9 }
 0x428   : > { %v3117_v17 = vpop.eup %3116 }
 0x429   : > { %v2175_v33 = vmul.f32 %v3117_v17, %v4226_v57 }
 0x42b   : > { %2430 = vst.msk [vmem:[%s4264_s27 + $0x38] sm:$0xff] %vm306_vm2, %v2175_v33 }
 0x42c   : > { %3162 = shalt.err (!%p3159_p5)
}
 0x42d   : > { %s3163_s19 = scalar_lea.hbm %s4291_s13, 1024  ;;  %s3167_s18 = scalar_lea.hbm %s4351_s6, 2048 }
 0x42e   : > { %p3164_p6 = scmp.ne.s32.totalorder %s4291_s13, %s3163_s19  ;;  %p3168_p10 = scmp.lt.s32.totalorder %s4291_s13, %s4351_s6 }
 0x42f   : > { %p3169_p11 = scmp.lt.s32.totalorder %s3167_s18, %s3163_s19 }
 0x430   : > { %p3165_p7 = pnand %p3164_p6, %p3307_p4 }
 0x431   : > { %p3170_p12 = por %p3169_p11, %p3168_p10 }
 0x432   : > { %p3166_p9 = pneg %p3165_p7 }
 0x434   : > { %p3171_p13 = pnand %p3170_p12, %p3166_p9 }
 0x436   : > { %3174 = shalt.err (!%p3171_p13)
}
 0x437   : > { %s3230_s11 = smov 128   ;;  %s3231_s12 = smov 8  }
 0x438   : > { %2839 = dma.vmem_to_hbm [thread:$0]  (%p3307_p4), %s4293_s8, 1024, %s4291_s13, %s4300_s24, %s3230_s11, %s3230_s11, %s3231_s12  }
 0x439 PF: > { %p2845_p0 = scmp.ge.s32.totalorder %s3225_s26, 2  ;;  %s2235_s14 = sand.u32 1, %s3205_s21  }
 0x43a   : > { %s2236_s15 = scalar_lea.sflag [#allocation6], %s2235_s14 }
 0x43b   : > { %p2842_p1 = pnand %p2845_p0, %p3314_p8 }
 0x43d   : > { %p2843_p2 = pneg %p2842_p1 }
 0x43f   : > { %3200 = dma.done.wait (%p2843_p2), %s2236_s15, 1024  }
 0x440   : > { %3202 = vsyncadd (%p2843_p2), %s2236_s15, 4294966272  ;;  %s20_s26 = sadd.s32 1, %s3225_s26   ;;  %s4360_s21 = smov %s3209_s22 }
 0x441   : > { %p17_p3 = scmp.ge.s32.totalorder %s20_s26, 4   ;;  %s4361_s22 = smov %s3213_s23 }
 0x442   : > { %s4362_s23 = smov %s3320_s10  ;;  %s4363_s24 = smov %s3221_s25 }
 0x443   : > { %s4364_s25 = smov %s4366_s29  ;;  %19 = sbr.rel (!%p17_p3) target bundleno = 4 (0x4), region = 97 }
 0x448   :  { %2241 = vsyncpa [#allocation6], 1 }
 0x449   :  { %2243 = vsyncpa [#allocation6 + $0x1], 1 }

</bundles_post_ra>
